<compile_context>
chip_gen: v7x
topology: tpu7x:2x2x1
jax: 0.10.0
libtpu: 0.0.40
codegen_flags: <defaults>
</compile_context>

<pallas_src>
import functools
import math

import numpy as np
import jax
import jax.numpy as jnp
from jax.experimental import pallas as pl
from jax.experimental.pallas import tpu as pltpu

_CENTER_TAP = 4  # tap index of (dh, dw) == (0, 0) in (dh+1)*3 + (dw+1) order


def _round_up(a, b):
    return ((a + b - 1) // b) * b


def _pick_row_tile(np_pad, row_unit, cap=1024):
    """Largest row tile that is a multiple of row_unit, divides np_pad, <= cap."""
    if np_pad <= cap:
        return np_pad
    n_units = np_pad // row_unit
    best = row_unit
    d = 1
    while d * row_unit <= cap:
        if n_units % d == 0:
            best = d * row_unit
        d += 1
    return best


def _build_tap_masks(row_tile, ph, pw):
    """(9, row_tile, 1) 0/1 masks: mask[t, n] = 1 iff pixel n's (dh, dw)
    neighbour lies inside the same region patch (conv zero padding otherwise).
    Row tiles are patch-aligned, so one mask pattern serves every tile."""
    n = np.arange(row_tile)
    h = (n // pw) % ph
    w = n % pw
    m = np.zeros((9, row_tile, 1), np.float32)
    for t in range(9):
        dh, dw = t // 3 - 1, t % 3 - 1
        valid = (h + dh >= 0) & (h + dh < ph) & (w + dw >= 0) & (w + dw < pw)
        m[t, valid, 0] = 1.0
    return m


def _region_kernel(x_ref, prm_ref, msk_ref, w_ref, o_ref, *, shifts):
    """One row-tile: BN(eval)+ReLU, 3x3 region conv (as one fused matmul),
    bias and residual.

    x_ref   : (RT, L_pad)      f32 activations (original values, for residual)
    prm_ref : (8, L_pad)       f32, rows 0/1/2 = BN scale / BN shift / conv bias
    msk_ref : (9, RT, 1)       f32 per-tap row validity masks
    w_ref   : (9*L_pad, L_pad) bf16 fused block-diagonal tap weights
    o_ref   : (RT, L_pad)      f32 output
    """
    x = x_ref[...]                                        # (RT, L)
    bn_scale = prm_ref[0:1, :]
    bn_shift = prm_ref[1:2, :]
    bias = prm_ref[2:3, :]
    y = jnp.maximum(x * bn_scale + bn_shift, 0.0)         # BN (folded) + ReLU, f32

    # 8 shifted+masked neighbour copies via sublane rolls (XLU) + row masks
    # (VPU); centre tap is y itself.  Rolls never cross a patch (mask handles
    # patch borders; tiles are patch-aligned so no halo is needed).
    taps = []
    for t in range(9):
        if t == _CENTER_TAP:
            taps.append(y)
        else:
            rolled = pltpu.roll(y, shift=shifts[t], axis=0) if shifts[t] else y
            taps.append(rolled * msk_ref[t])              # (RT, 1) lane-broadcast

    # Single wide-K MXU matmul: (RT, 9*L) @ (9*L, L), bf16 in, f32 accumulate.
    ybig = jnp.concatenate(taps, axis=1).astype(w_ref.dtype)
    acc = jnp.dot(ybig, w_ref[...], preferred_element_type=jnp.float32)

    o_ref[...] = acc + bias + x                           # conv bias + residual


def region_layer_pallas(x, gamma, beta, run_mean, run_var, conv_w, conv_b,
                        region_grid=(8, 8), eps=1e-5, matmul_dtype=jnp.bfloat16):
    B, C, H, W = x.shape
    gh, gw = region_grid
    ph, pw = H // gh, W // gw
    N = gh * gw
    NP = B * ph * pw
    L = N * C
    patch = ph * pw
    f32 = jnp.float32

    # Original module's network indexing quirk: region (i, j) -> networks[i*j + j].
    ii, jj = np.meshgrid(np.arange(gh), np.arange(gw), indexing="ij")
    net_idx = jnp.asarray((ii * jj + jj).reshape(-1))                  # (N,)

    # Padding / tiling: lanes to a multiple of 128; rows to a multiple of both
    # 8 (sublane tile) and the patch size, so row tiles are (8,128)-aligned and
    # never split a region patch (rolls stay inside a tile, masks tile-invariant).
    L_pad = _round_up(L, 128)
    row_unit = (8 * patch) // math.gcd(8, patch)
    NP_pad = _round_up(NP, row_unit)
    row_tile = _pick_row_tile(NP_pad, row_unit)
    n_row_tiles = NP_pad // row_tile

    # ---- plain-JAX glue: fold BN, gather per-region params ----
    scale = (gamma.astype(f32) / jnp.sqrt(run_var.astype(f32) + eps))  # (Nnet, C)
    shift = beta.astype(f32) - run_mean.astype(f32) * scale
    scale_row = scale[net_idx].reshape(-1)                             # (L,)
    shift_row = shift[net_idx].reshape(-1)
    bias_row = conv_b.astype(f32)[net_idx].reshape(-1)
    prm = jnp.zeros((8, L_pad), f32)
    prm = (prm.at[0, :L].set(scale_row)
              .at[1, :L].set(shift_row)
              .at[2, :L].set(bias_row))

    # torch Conv2d weight (O, I, 3, 3) per net -> fused (9*L_pad, L_pad):
    # tap-t slab = block-diagonal matrix whose r-th CxC block is (Ci, Co) of
    # region r's tap (dh, dw) with t = (dh+1)*3 + (dw+1).
    w_r = conv_w.astype(f32)[net_idx]                                  # (N, Co, Ci, 3, 3)
    w_taps = jnp.transpose(w_r, (3, 4, 0, 2, 1)).reshape(9, N, C, C)   # (t, r, Ci, Co)
    eye = jnp.eye(N, dtype=f32)
    w_bd = jnp.einsum('trio,rs->triso', w_taps, eye).reshape(9, L, L)
    w_bd = jnp.pad(w_bd, ((0, 0), (0, L_pad - L), (0, L_pad - L)))
    w_fused = w_bd.reshape(9 * L_pad, L_pad).astype(matmul_dtype)

    # Input relayout: (B,C,H,W) -> (NP_pad, L_pad), rows = (b, hp, wp),
    # lanes = (region i*gw+j, channel).
    xr = jnp.transpose(x, (0, 2, 3, 1)).reshape(B, gh, ph, gw, pw, C)
    xr = jnp.transpose(xr, (0, 2, 4, 1, 3, 5)).reshape(NP, L).astype(f32)
    xr = jnp.pad(xr, ((0, NP_pad - NP), (0, L_pad - L)))

    # Per-tap validity masks and (static) sublane roll amounts.
    masks = jnp.asarray(_build_tap_masks(row_tile, ph, pw))            # (9, RT, 1)
    shifts = tuple(
        int((-((t // 3 - 1) * pw + (t % 3 - 1))) % row_tile) for t in range(9))

    # Explicit scoped-VMEM budget (in/out double buffers + weights + concat
    # intermediate), with headroom, capped at v7x's 64 MiB physical VMEM.
    mm_bytes = jnp.dtype(matmul_dtype).itemsize
    est = (2 * 2 * row_tile * L_pad * 4
           + 2 * 9 * L_pad * L_pad * mm_bytes
           + 2 * 8 * L_pad * 4 + 2 * 9 * row_tile * 128 * 4
           + row_tile * 9 * L_pad * (4 + mm_bytes))
    vmem_limit = int(min(64 * (2 ** 20), max(16 * (2 ** 20), 2 * est)))

    kernel = functools.partial(_region_kernel, shifts=shifts)

    out_r = pl.pallas_call(
        kernel,
        out_shape=jax.ShapeDtypeStruct((NP_pad, L_pad), f32),
        grid=(n_row_tiles,),
        in_specs=[
            pl.BlockSpec((row_tile, L_pad), lambda r: (r, 0)),      # activations
            pl.BlockSpec((8, L_pad), lambda r: (0, 0)),             # BN scale/shift + bias
            pl.BlockSpec((9, row_tile, 1), lambda r: (0, 0, 0)),    # tap validity masks
            pl.BlockSpec((9 * L_pad, L_pad), lambda r: (0, 0)),     # fused tap weights
        ],
        out_specs=pl.BlockSpec((row_tile, L_pad), lambda r: (r, 0)),
        compiler_params=pltpu.CompilerParams(
            dimension_semantics=("parallel",),
            vmem_limit_bytes=vmem_limit),
    )(xr, prm, masks, w_fused)

    # ---- glue: back to NCHW ----
    out = out_r[:NP, :L].reshape(B, ph, pw, gh, gw, C)
    out = jnp.transpose(out, (0, 3, 1, 4, 2, 5)).reshape(B, H, W, C)
    return jnp.transpose(out, (0, 3, 1, 2)).astype(x.dtype)


def region_layer_ref(x, gamma, beta, run_mean, run_var, conv_w, conv_b,
                     region_grid=(8, 8), eps=1e-5):
    """Plain-JAX mirror of the PyTorch forward (eval-mode BN)."""
    B, C, H, W = x.shape
    gh, gw = region_grid
    ph, pw = H // gh, W // gw
    rows = []
    for i in range(gh):
        cols = []
        for j in range(gw):
            idx = i * j + j                     # intentional quirk of the module
            patch = x[:, :, i * ph:(i + 1) * ph, j * pw:(j + 1) * pw]
            y = (patch - run_mean[idx][None, :, None, None]) / jnp.sqrt(
                run_var[idx][None, :, None, None] + eps)
            y = y * gamma[idx][None, :, None, None] + beta[idx][None, :, None, None]
            y = jnp.maximum(y, 0.0)
            o = jax.lax.conv_general_dilated(
                y, conv_w[idx], window_strides=(1, 1),
                padding=((1, 1), (1, 1)),
                dimension_numbers=("NCHW", "OIHW", "NCHW"))
            o = o + conv_b[idx][None, :, None, None] + patch
            cols.append(o)
        rows.append(jnp.concatenate(cols, axis=3))
    return jnp.concatenate(rows, axis=2)


if __name__ == "__main__":
    B, C, H, W = 2, 4, 16, 16          # NCHW input, like the PyTorch module
    region_grid = (8, 8)               # module default grid
    N = region_grid[0] * region_grid[1]

    key = jax.random.PRNGKey(0)
    ks = jax.random.split(key, 7)
    x = jax.random.normal(ks[0], (B, C, H, W), jnp.float32)
    gamma = 1.0 + 0.1 * jax.random.normal(ks[1], (N, C), jnp.float32)
    beta = 0.1 * jax.random.normal(ks[2], (N, C), jnp.float32)
    run_mean = 0.1 * jax.random.normal(ks[3], (N, C), jnp.float32)
    run_var = 1.0 + 0.5 * jax.random.uniform(ks[4], (N, C), jnp.float32)
    conv_w = 0.2 * jax.random.normal(ks[5], (N, C, C, 3, 3), jnp.float32)  # OIHW per net
    conv_b = 0.1 * jax.random.normal(ks[6], (N, C), jnp.float32)

    out = region_layer_pallas(x, gamma, beta, run_mean, run_var,
                              conv_w, conv_b, region_grid=region_grid)
    out = jax.block_until_ready(out)

    ref = region_layer_ref(x, gamma, beta, run_mean, run_var,
                           conv_w, conv_b, region_grid=region_grid)
    # Tolerance sized for bf16 MXU inputs (per perf review); with
    # matmul_dtype=jnp.float32 this comfortably passes at 2e-3.
    np.testing.assert_allclose(np.asarray(out), np.asarray(ref),
                               rtol=3e-2, atol=3e-2)
    print("KERNEL_OK")
</pallas_src>

<mosaic_0001>
module attributes {stable_mosaic.version = 11 : i64} {
  func.func @_region_kernel(%arg0: i32, %arg1: memref<8x256xf32, #tpu.memory_space<vmem>>, %arg2: memref<8x256xf32, #tpu.memory_space<vmem>>, %arg3: memref<9x8x1xf32, #tpu.memory_space<vmem>>, %arg4: memref<2304x256xbf16, #tpu.memory_space<vmem>>, %arg5: memref<8x256xf32, #tpu.memory_space<vmem>>) attributes {dimension_semantics = [#tpu.dimension_semantics<parallel>], iteration_bounds = array<i64: 1>, scalar_prefetch = 0 : i64, scratch_operands = 0 : i64, tpu.core_type = #tpu.core_type<tc>, window_params = [{transform_indices = @transform_0, window_bounds = array<i64: 8, 256>}, {pipeline_mode = #tpu.pipeline_mode<synchronous>, transform_indices = @transform_1, window_bounds = array<i64: 8, 256>}, {pipeline_mode = #tpu.pipeline_mode<synchronous>, transform_indices = @transform_2, window_bounds = array<i64: 9, 8, 1>}, {pipeline_mode = #tpu.pipeline_mode<synchronous>, transform_indices = @transform_3, window_bounds = array<i64: 2304, 256>}, {transform_indices = @transform_4, window_bounds = array<i64: 8, 256>}]} {
    %c0 = arith.constant 0 : index
    %c0_0 = arith.constant 0 : index
    %0 = vector.load %arg1[%c0, %c0_0] : memref<8x256xf32, #tpu.memory_space<vmem>>, vector<8x256xf32>
    %c0_1 = arith.constant 0 : index
    %c0_2 = arith.constant 0 : index
    %1 = vector.load %arg2[%c0_1, %c0_2] : memref<8x256xf32, #tpu.memory_space<vmem>>, vector<1x256xf32>
    %c1 = arith.constant 1 : index
    %c0_3 = arith.constant 0 : index
    %2 = vector.load %arg2[%c1, %c0_3] : memref<8x256xf32, #tpu.memory_space<vmem>>, vector<1x256xf32>
    %c2 = arith.constant 2 : index
    %c0_4 = arith.constant 0 : index
    %3 = vector.load %arg2[%c2, %c0_4] : memref<8x256xf32, #tpu.memory_space<vmem>>, vector<1x256xf32>
    %4 = vector.broadcast %1 : vector<1x256xf32> to vector<8x256xf32>
    %5 = arith.mulf %0, %4 : vector<8x256xf32>
    %6 = vector.broadcast %2 : vector<1x256xf32> to vector<8x256xf32>
    %7 = arith.addf %5, %6 : vector<8x256xf32>
    %cst = arith.constant 0.000000e+00 : f32
    %8 = vector.broadcast %cst : f32 to vector<8x256xf32>
    %9 = arith.maximumf %7, %8 : vector<8x256xf32>
    %c3_i32 = arith.constant 3 : i32
    %10 = tpu.dynamic_rotate %9 by %c3_i32 dim 0 : vector<8x256xf32>, i32 -> vector<8x256xf32>
    %c0_5 = arith.constant 0 : index
    %c0_6 = arith.constant 0 : index
    %c0_7 = arith.constant 0 : index
    %11 = vector.load %arg3[%c0_5, %c0_6, %c0_7] : memref<9x8x1xf32, #tpu.memory_space<vmem>>, vector<1x8x1xf32>
    %12 = vector.shape_cast %11 : vector<1x8x1xf32> to vector<8x1xf32>
    %13 = vector.broadcast %12 : vector<8x1xf32> to vector<8x256xf32>
    %14 = arith.mulf %10, %13 : vector<8x256xf32>
    %c2_i32 = arith.constant 2 : i32
    %15 = tpu.dynamic_rotate %9 by %c2_i32 dim 0 : vector<8x256xf32>, i32 -> vector<8x256xf32>
    %c1_8 = arith.constant 1 : index
    %c0_9 = arith.constant 0 : index
    %c0_10 = arith.constant 0 : index
    %16 = vector.load %arg3[%c1_8, %c0_9, %c0_10] : memref<9x8x1xf32, #tpu.memory_space<vmem>>, vector<1x8x1xf32>
    %17 = vector.shape_cast %16 : vector<1x8x1xf32> to vector<8x1xf32>
    %18 = vector.broadcast %17 : vector<8x1xf32> to vector<8x256xf32>
    %19 = arith.mulf %15, %18 : vector<8x256xf32>
    %c1_i32 = arith.constant 1 : i32
    %20 = tpu.dynamic_rotate %9 by %c1_i32 dim 0 : vector<8x256xf32>, i32 -> vector<8x256xf32>
    %c2_11 = arith.constant 2 : index
    %c0_12 = arith.constant 0 : index
    %c0_13 = arith.constant 0 : index
    %21 = vector.load %arg3[%c2_11, %c0_12, %c0_13] : memref<9x8x1xf32, #tpu.memory_space<vmem>>, vector<1x8x1xf32>
    %22 = vector.shape_cast %21 : vector<1x8x1xf32> to vector<8x1xf32>
    %23 = vector.broadcast %22 : vector<8x1xf32> to vector<8x256xf32>
    %24 = arith.mulf %20, %23 : vector<8x256xf32>
    %c1_i32_14 = arith.constant 1 : i32
    %25 = tpu.dynamic_rotate %9 by %c1_i32_14 dim 0 : vector<8x256xf32>, i32 -> vector<8x256xf32>
    %c3 = arith.constant 3 : index
    %c0_15 = arith.constant 0 : index
    %c0_16 = arith.constant 0 : index
    %26 = vector.load %arg3[%c3, %c0_15, %c0_16] : memref<9x8x1xf32, #tpu.memory_space<vmem>>, vector<1x8x1xf32>
    %27 = vector.shape_cast %26 : vector<1x8x1xf32> to vector<8x1xf32>
    %28 = vector.broadcast %27 : vector<8x1xf32> to vector<8x256xf32>
    %29 = arith.mulf %25, %28 : vector<8x256xf32>
    %c7_i32 = arith.constant 7 : i32
    %30 = tpu.dynamic_rotate %9 by %c7_i32 dim 0 : vector<8x256xf32>, i32 -> vector<8x256xf32>
    %c5 = arith.constant 5 : index
    %c0_17 = arith.constant 0 : index
    %c0_18 = arith.constant 0 : index
    %31 = vector.load %arg3[%c5, %c0_17, %c0_18] : memref<9x8x1xf32, #tpu.memory_space<vmem>>, vector<1x8x1xf32>
    %32 = vector.shape_cast %31 : vector<1x8x1xf32> to vector<8x1xf32>
    %33 = vector.broadcast %32 : vector<8x1xf32> to vector<8x256xf32>
    %34 = arith.mulf %30, %33 : vector<8x256xf32>
    %c7_i32_19 = arith.constant 7 : i32
    %35 = tpu.dynamic_rotate %9 by %c7_i32_19 dim 0 : vector<8x256xf32>, i32 -> vector<8x256xf32>
    %c6 = arith.constant 6 : index
    %c0_20 = arith.constant 0 : index
    %c0_21 = arith.constant 0 : index
    %36 = vector.load %arg3[%c6, %c0_20, %c0_21] : memref<9x8x1xf32, #tpu.memory_space<vmem>>, vector<1x8x1xf32>
    %37 = vector.shape_cast %36 : vector<1x8x1xf32> to vector<8x1xf32>
    %38 = vector.broadcast %37 : vector<8x1xf32> to vector<8x256xf32>
    %39 = arith.mulf %35, %38 : vector<8x256xf32>
    %c6_i32 = arith.constant 6 : i32
    %40 = tpu.dynamic_rotate %9 by %c6_i32 dim 0 : vector<8x256xf32>, i32 -> vector<8x256xf32>
    %c7 = arith.constant 7 : index
    %c0_22 = arith.constant 0 : index
    %c0_23 = arith.constant 0 : index
    %41 = vector.load %arg3[%c7, %c0_22, %c0_23] : memref<9x8x1xf32, #tpu.memory_space<vmem>>, vector<1x8x1xf32>
    %42 = vector.shape_cast %41 : vector<1x8x1xf32> to vector<8x1xf32>
    %43 = vector.broadcast %42 : vector<8x1xf32> to vector<8x256xf32>
    %44 = arith.mulf %40, %43 : vector<8x256xf32>
    %c5_i32 = arith.constant 5 : i32
    %45 = tpu.dynamic_rotate %9 by %c5_i32 dim 0 : vector<8x256xf32>, i32 -> vector<8x256xf32>
    %c8 = arith.constant 8 : index
    %c0_24 = arith.constant 0 : index
    %c0_25 = arith.constant 0 : index
    %46 = vector.load %arg3[%c8, %c0_24, %c0_25] : memref<9x8x1xf32, #tpu.memory_space<vmem>>, vector<1x8x1xf32>
    %47 = vector.shape_cast %46 : vector<1x8x1xf32> to vector<8x1xf32>
    %48 = vector.broadcast %47 : vector<8x1xf32> to vector<8x256xf32>
    %49 = arith.mulf %45, %48 : vector<8x256xf32>
    %50 = tpu.concatenate %14, %19, %24, %29, %9, %34, %39, %44, %49 in 1 : vector<8x256xf32>, vector<8x256xf32>, vector<8x256xf32>, vector<8x256xf32>, vector<8x256xf32>, vector<8x256xf32>, vector<8x256xf32>, vector<8x256xf32>, vector<8x256xf32> -> vector<8x2304xf32>
    %51 = arith.truncf %50 : vector<8x2304xf32> to vector<8x2304xbf16>
    %c0_26 = arith.constant 0 : index
    %c0_27 = arith.constant 0 : index
    %52 = vector.load %arg4[%c0_26, %c0_27] : memref<2304x256xbf16, #tpu.memory_space<vmem>>, vector<2304x256xbf16>
    %cst_28 = arith.constant dense<0.000000e+00> : vector<8x256xf32>
    %53 = tpu.matmul %51, %52, %cst_28 {dimension_numbers = #tpu.dot_dimension_numbers<[1], [0], [0], [1], [0, 0, 1, 1], [], []>} : vector<8x2304xbf16>, vector<2304x256xbf16>, vector<8x256xf32> -> vector<8x256xf32>
    %54 = vector.broadcast %3 : vector<1x256xf32> to vector<8x256xf32>
    %55 = arith.addf %53, %54 : vector<8x256xf32>
    %56 = arith.addf %55, %0 : vector<8x256xf32>
    %c0_29 = arith.constant 0 : index
    %c0_30 = arith.constant 0 : index
    %57 = vector.load %arg5[%c0_29, %c0_30] : memref<8x256xf32, #tpu.memory_space<vmem>>, vector<8x256xf32>
    tpu.vector_store %arg5[%c0_29, %c0_30], %56 {strides = array<i32>} : memref<8x256xf32, #tpu.memory_space<vmem>>, vector<8x256xf32>,
    return
  }
  func.func @transform_0(%arg0: i32) -> (i32, i32) {
    %c0_i32 = arith.constant 0 : i32
    %c0_i32_0 = arith.constant 0 : i32
    return %arg0, %c0_i32 : i32, i32
  }
  func.func @transform_1(%arg0: i32) -> (i32, i32) {
    %c0_i32 = arith.constant 0 : i32
    %c0_i32_0 = arith.constant 0 : i32
    %c0_i32_1 = arith.constant 0 : i32
    return %c0_i32, %c0_i32_0 : i32, i32
  }
  func.func @transform_2(%arg0: i32) -> (i32, i32, i32) {
    %c0_i32 = arith.constant 0 : i32
    %c0_i32_0 = arith.constant 0 : i32
    %c0_i32_1 = arith.constant 0 : i32
    %c0_i32_2 = arith.constant 0 : i32
    return %c0_i32, %c0_i32_0, %c0_i32_1 : i32, i32, i32
  }
  func.func @transform_3(%arg0: i32) -> (i32, i32) {
    %c0_i32 = arith.constant 0 : i32
    %c0_i32_0 = arith.constant 0 : i32
    %c0_i32_1 = arith.constant 0 : i32
    return %c0_i32, %c0_i32_0 : i32, i32
  }
  func.func @transform_4(%arg0: i32) -> (i32, i32) {
    %c0_i32 = arith.constant 0 : i32
    %c0_i32_0 = arith.constant 0 : i32
    return %arg0, %c0_i32 : i32, i32
  }
}

</mosaic_0001>

<bundles_post_ra>
// kernel: tpu_custom_call.1
= control target key start
LH: loop header
LB: loop body
LE: loop exit
PB: predicated region body
PF: predicated region fallthrough
CT: control target
= control target key end

     0   :  { %9 = vsyncpa [#allocation3], 0  ;;  %s3317_s0 = inlined_call_operand.hbm [shape: f32[8,256], index: 0, kind: input, shape index: {}]   ;;  %s3318_s1 = inlined_call_operand.hbm [shape: f32[8,256], index: 1, kind: input, shape index: {}]   ;;  %s3319_s2 = inlined_call_operand.vmem [shape: f32[9,8,1], index: 2, kind: input, shape index: {}]   ;;  %s3320_s3 = inlined_call_operand.hbm [shape: bf16[2304,256], index: 3, kind: input, shape index: {}]   ;;  %s3321_s4 = inlined_call_operand.hbm [shape: f32[8,256], index: 4, kind: output, shape index: {}]  }
   0x1   :  { %10 = vsyncpa [#allocation6], 0 }
   0x2   :  { %11 = vsyncpa [#allocation4], 0  ;;  %s3151_s15 = smov [#allocation5]   ;;  %s3152_s17 = smov [#allocation2]  }
   0x3   :  { %s28_s16 = sshll.u32 %s3151_s15, 4  ;;  %s18_s18 = sshll.u32 %s3152_s17, 4  ;;  %s29_s16 = int_to_ptr.vmem [resolvable:$true] %s28_s16  ;;  %s19_s18 = int_to_ptr.vmem [resolvable:$true] %s18_s18 }
   0x4   :  { %s3057_s21 = scalar_lea.hbm %s3318_s1, 256 }
   0x5   :  { %p3058_p0 = scmp.ne.s32.totalorder %s3318_s1, %s3057_s21  ;;  %p3061_p1 = scmp.lt.u32.totalorder %s3057_s21, %s3318_s1 }
   0x7   :  { %p3063_p2 = pnand %p3061_p1, %p3058_p0 }
   0x9   :  { %3066 = shalt.err (!%p3063_p2)
}
   0xa   :  { %s3067_s26 = scalar_lea.vmem %s29_s16, 256  ;;  %p3072_p4 = scmp.lt.s32.totalorder %s29_s16, %s29_s16 }
   0xb   :  { %p3068_p3 = scmp.ne.s32.totalorder %s29_s16, %s3067_s26  ;;  %p3073_p5 = scmp.lt.s32.totalorder %s3067_s26, %s3067_s26 }
   0xd   :  { %p3074_p6 = por %p3073_p5, %p3072_p4 }
   0xf   :  { %p3075_p7 = pnand %p3074_p6, %p3068_p3 }
  0x11   :  { %3078 = shalt.err (!%p3075_p7)
}
  0x12   :  { %31 = dma.hbm_to_vmem [thread:$0]  %s3318_s1, 256, %s29_s16, [#allocation6]  }
  0x13   :  { %s3079_s5 = scalar_lea.hbm %s3317_s0, 256 }
  0x14   :  { %p3080_p8 = scmp.ne.s32.totalorder %s3317_s0, %s3079_s5  ;;  %p3083_p9 = scmp.lt.u32.totalorder %s3079_s5, %s3317_s0 }
  0x16   :  { %p3085_p10 = pnand %p3083_p9, %p3080_p8 }
  0x18   :  { %3088 = shalt.err (!%p3085_p10)
}
  0x19   :  { %s3089_s10 = scalar_lea.vmem %s19_s18, 256  ;;  %p3094_p12 = scmp.lt.s32.totalorder %s19_s18, %s19_s18 }
  0x1a   :  { %p3090_p11 = scmp.ne.s32.totalorder %s19_s18, %s3089_s10  ;;  %p3095_p13 = scmp.lt.s32.totalorder %s3089_s10, %s3089_s10 }
  0x1c   :  { %p3096_p0 = por %p3095_p13, %p3094_p12 }
  0x1e   :  { %p3097_p1 = pnand %p3096_p0, %p3090_p11 }
  0x20   :  { %3100 = shalt.err (!%p3097_p1)
}
  0x21   :  { %21 = dma.hbm_to_vmem [thread:$0]  %s3317_s0, 256, %s19_s18, [#allocation3]  }
  0x22   :  { %s3153_s12 = smov [#allocation7]   ;;  %s3101_s16 = scalar_lea.hbm %s3320_s3, 36864 }
  0x23   :  { %s39_s13 = sshll.u32 %s3153_s12, 4  ;;  %p3102_p2 = scmp.ne.s32.totalorder %s3320_s3, %s3101_s16  ;;  %s40_s13 = int_to_ptr.vmem [resolvable:$true] %s39_s13 }
  0x24   :  { %p3105_p3 = scmp.lt.u32.totalorder %s3101_s16, %s3320_s3 }
  0x26   :  { %p3107_p4 = pnand %p3105_p3, %p3102_p2 }
  0x28   :  { %3110 = shalt.err (!%p3107_p4)
}
  0x29   :  { %s3111_s22 = scalar_lea.vmem %s40_s13, 36864  ;;  %p3116_p6 = scmp.lt.s32.totalorder %s40_s13, %s40_s13 }
  0x2a   :  { %p3112_p5 = scmp.ne.s32.totalorder %s40_s13, %s3111_s22  ;;  %p3117_p7 = scmp.lt.s32.totalorder %s3111_s22, %s3111_s22 }
  0x2c   :  { %p3118_p8 = por %p3117_p7, %p3116_p6 }
  0x2e   :  { %p3119_p9 = pnand %p3118_p8, %p3112_p5 }
  0x30   :  { %3122 = shalt.err (!%p3119_p9)
}
  0x31   :  { %s3154_s0 = smov 128   ;;  %s3155_s18 = smov 8  }
  0x32   :  { %45 = dma.hbm_to_vmem [thread:$0]  %s3320_s3, 36864, %s40_s13, [#allocation6], %s3154_s0, %s3154_s0, %s3155_s18  }
  0x33   :  { %3145 = dma.done.wait [#allocation3], 256  }
  0x34   :  { %3146 = vsyncadd [#allocation3], 4294967040 }
  0x35   :  { %3147 = dma.done.wait [#allocation6], 37120  }
  0x36   :  { %3148 = vsyncadd [#allocation6], 4294930176  ;;  %v3156_v0 = vmov 0   ;;  %v92_v1 = vld [vmem:[%s3319_s2] sm:$0xff]  ;;  %v2320_v2 = vld [vmem:[%s3319_s2 + $0x10] sm:$0xff] }
  0x37   :  { %2621 = vset.pattern.permute.xlu0 %v3156_v0  ;;  %2622 = vset.pattern.permute.xlu1 %v3156_v0  ;;  %v2319_v3 = vld [vmem:[%s3319_s2 + $0x8] sm:$0xff]  ;;  %v2321_v4 = vld [vmem:[%s3319_s2 + $0x18] sm:$0xff]  ;;  %v2323_v9 = vld [vmem:[%s3319_s2 + $0x30] sm:$0xff] }
  0x38   :  { %95 = vperm.xlu0 %2621, %v92_v1   ;;  %117 = vperm.xlu1 %2622, %v2320_v2   ;;  %v2623_v5 = vld [vmem:[#allocation7 + $0x4] ss:$8 sps:$4 sm:$0xff]   ;;  %v2625_v6 = vld [vmem:[#allocation7] ss:$8 sps:$4 sm:$0xff]   ;;  %v2626_v8 = vld [vmem:[#allocation7 + $0x14] ss:$8 sps:$4 sm:$0xff]  }
  0x39   :  { %v2322_v7 = vld [vmem:[%s3319_s2 + $0x28] sm:$0xff]  ;;  %1930 = vmatprep.subr.bf16.mxu0 %v2623_v5  ;;  %v2630_v11 = vld [vmem:[#allocation7 + $0x10] ss:$8 sps:$4 sm:$0xff]   ;;  %v2634_v15 = vld [vmem:[#allocation7 + $0x114] ss:$8 sps:$4 sm:$0xff]  }
  0x3a   :  { %v2628_v10 = vld [vmem:[#allocation7 + $0x104] ss:$8 sps:$4 sm:$0xff]   ;;  %1931 = vmatpush1.bf16.msra.mxu0 %v2625_v6  ;;  %v2631_v12 = vld [vmem:[#allocation7 + $0x100] ss:$8 sps:$4 sm:$0xff]   ;;  %v2324_v14 = vld [vmem:[%s3319_s2 + $0x38] sm:$0xff] }
  0x3b   :  { %1932 = vmatprep.subr.bf16.mxu0 %v2626_v8  ;;  %1971 = vmatprep.subr.bf16.mxu1 %v2628_v10  ;;  %v2632_v13 = vld [vmem:[#allocation7 + $0x24] ss:$8 sps:$4 sm:$0xff]   ;;  %v2637_v16 = vld [vmem:[#allocation7 + $0x110] ss:$8 sps:$4 sm:$0xff]   ;;  %v2636_v17 = vld [vmem:[#allocation7 + $0x20] ss:$8 sps:$4 sm:$0xff]  }
  0x3c   :  { %106 = vperm.xlu0 %2621, %v2319_v3   ;;  %126 = vperm.xlu1 %2622, %v2321_v4   ;;  %v2325_v18 = vld [vmem:[%s3319_s2 + $0x40] sm:$0xff]  ;;  %v2638_v19 = vld [vmem:[#allocation7 + $0x34] ss:$8 sps:$4 sm:$0xff]   ;;  %v2642_v23 = vld [vmem:[#allocation7 + $0x30] ss:$8 sps:$4 sm:$0xff]   ;;  %s3157_s2 = smov [#allocation8]  }
  0x3d   :  { %1972 = vmatpush1.bf16.msra.mxu1 %v2631_v12  ;;  %v2640_v20 = vld [vmem:[#allocation7 + $0x124] ss:$8 sps:$4 sm:$0xff]   ;;  %v2643_v21 = vld [vmem:[#allocation7 + $0x120] ss:$8 sps:$4 sm:$0xff]   ;;  %v2646_v22 = vld [vmem:[#allocation7 + $0x134] ss:$8 sps:$4 sm:$0xff]  }
  0x3e   :  { %1933 = vmatpush1.bf16.msra.mxu0 %v2630_v11  ;;  %1973 = vmatprep.subr.bf16.mxu1 %v2634_v15  ;;  %v2644_v24 = vld [vmem:[#allocation7 + $0x44] ss:$8 sps:$4 sm:$0xff]   ;;  %v2649_v25 = vld [vmem:[#allocation7 + $0x130] ss:$8 sps:$4 sm:$0xff]   ;;  %v2648_v27 = vld [vmem:[#allocation7 + $0x40] ss:$8 sps:$4 sm:$0xff]   ;;  %v63_v11 = vlaneseq }
  0x3f   :  { %1934 = vmatprep.subr.bf16.mxu0 %v2632_v13  ;;  %v2652_v26 = vld [vmem:[#allocation7 + $0x144] ss:$8 sps:$4 sm:$0xff]   ;;  %v2650_v28 = vld [vmem:[#allocation7 + $0x54] ss:$8 sps:$4 sm:$0xff]   ;;  %v2655_v29 = vld [vmem:[#allocation7 + $0x140] ss:$8 sps:$4 sm:$0xff]  }
  0x40   :  { %137 = vperm.xlu0 %2621, %v2322_v7   ;;  %146 = vperm.xlu1 %2622, %v2323_v9   ;;  %v2658_v30 = vld [vmem:[#allocation7 + $0x154] ss:$8 sps:$4 sm:$0xff]   ;;  %v2654_v31 = vld [vmem:[#allocation7 + $0x50] ss:$8 sps:$4 sm:$0xff]   ;;  %v2656_v32 = vld [vmem:[#allocation7 + $0x64] ss:$8 sps:$4 sm:$0xff]  }
  0x41   :  { %1974 = vmatpush1.bf16.msra.mxu1 %v2637_v16  ;;  %v2661_v33 = vld [vmem:[#allocation7 + $0x150] ss:$8 sps:$4 sm:$0xff]   ;;  %v2664_v34 = vld [vmem:[#allocation7 + $0x164] ss:$8 sps:$4 sm:$0xff]   ;;  %v2660_v35 = vld [vmem:[#allocation7 + $0x60] ss:$8 sps:$4 sm:$0xff]  }
  0x42   :  { %1975 = vmatprep.subr.bf16.mxu1 %v2640_v20  ;;  %1935 = vmatpush1.bf16.msra.mxu0 %v2636_v17  ;;  %v2662_v36 = vld [vmem:[#allocation7 + $0x74] ss:$8 sps:$4 sm:$0xff]   ;;  %v2667_v37 = vld [vmem:[#allocation7 + $0x160] ss:$8 sps:$4 sm:$0xff]   ;;  %v2666_v39 = vld [vmem:[#allocation7 + $0x70] ss:$8 sps:$4 sm:$0xff]  }
  0x43   :  { %1936 = vmatprep.subr.bf16.mxu0 %v2638_v19  ;;  %v2670_v38 = vld [vmem:[#allocation7 + $0x174] ss:$8 sps:$4 sm:$0xff]   ;;  %v2668_v40 = vld [vmem:[#allocation7 + $0x84] ss:$8 sps:$4 sm:$0xff]   ;;  %v2673_v41 = vld [vmem:[#allocation7 + $0x170] ss:$8 sps:$4 sm:$0xff]  }
  0x44   :  { %157 = vperm.xlu0 %2621, %v2324_v14   ;;  %168 = vperm.xlu1 %2622, %v2325_v18   ;;  %v2676_v42 = vld [vmem:[#allocation7 + $0x184] ss:$8 sps:$4 sm:$0xff]   ;;  %v2672_v43 = vld [vmem:[#allocation7 + $0x80] ss:$8 sps:$4 sm:$0xff]   ;;  %v2674_v44 = vld [vmem:[#allocation7 + $0x94] ss:$8 sps:$4 sm:$0xff]  }
  0x45   :  { %1976 = vmatpush1.bf16.msra.mxu1 %v2643_v21  ;;  %v2679_v45 = vld [vmem:[#allocation7 + $0x180] ss:$8 sps:$4 sm:$0xff]   ;;  %v2682_v46 = vld [vmem:[#allocation7 + $0x194] ss:$8 sps:$4 sm:$0xff]   ;;  %v2678_v47 = vld [vmem:[#allocation7 + $0x90] ss:$8 sps:$4 sm:$0xff]  }
  0x46   :  { %1977 = vmatprep.subr.bf16.mxu1 %v2646_v22  ;;  %1937 = vmatpush1.bf16.msra.mxu0 %v2642_v23  ;;  %v2680_v48 = vld [vmem:[#allocation7 + $0xa4] ss:$8 sps:$4 sm:$0xff]   ;;  %v2685_v49 = vld [vmem:[#allocation7 + $0x190] ss:$8 sps:$4 sm:$0xff]   ;;  %v2684_v51 = vld [vmem:[#allocation7 + $0xa0] ss:$8 sps:$4 sm:$0xff]  }
  0x47   :  { %1938 = vmatprep.subr.bf16.mxu0 %v2644_v24  ;;  %v2688_v50 = vld [vmem:[#allocation7 + $0x1a4] ss:$8 sps:$4 sm:$0xff]   ;;  %v2686_v52 = vld [vmem:[#allocation7 + $0xb4] ss:$8 sps:$4 sm:$0xff]   ;;  %v2691_v53 = vld [vmem:[#allocation7 + $0x1a0] ss:$8 sps:$4 sm:$0xff]  }
  0x48   :  { %v2694_v54 = vld [vmem:[#allocation7 + $0x1b4] ss:$8 sps:$4 sm:$0xff]   ;;  %v2690_v55 = vld [vmem:[#allocation7 + $0xb0] ss:$8 sps:$4 sm:$0xff]   ;;  %v2692_v56 = vld [vmem:[#allocation7 + $0xc4] ss:$8 sps:$4 sm:$0xff]  }
  0x49   :  { %1978 = vmatpush1.bf16.msra.mxu1 %v2649_v25  ;;  %v2697_v57 = vld [vmem:[#allocation7 + $0x1b0] ss:$8 sps:$4 sm:$0xff]   ;;  %v2700_v58 = vld [vmem:[#allocation7 + $0x1c4] ss:$8 sps:$4 sm:$0xff]   ;;  %v2696_v59 = vld [vmem:[#allocation7 + $0xc0] ss:$8 sps:$4 sm:$0xff]  }
  0x4a   :  { %1979 = vmatprep.subr.bf16.mxu1 %v2652_v26  ;;  %1939 = vmatpush1.bf16.msra.mxu0 %v2648_v27  ;;  %v2698_v60 = vld [vmem:[#allocation7 + $0xd4] ss:$8 sps:$4 sm:$0xff]   ;;  %v2703_v61 = vld [vmem:[#allocation7 + $0x1c0] ss:$8 sps:$4 sm:$0xff]   ;;  %v2702_v63 = vld [vmem:[#allocation7 + $0xd0] ss:$8 sps:$4 sm:$0xff]  }
  0x4b   :  { %1940 = vmatprep.subr.bf16.mxu0 %v2650_v28  ;;  %v2706_v62 = vld [vmem:[#allocation7 + $0x1d4] ss:$8 sps:$4 sm:$0xff]   ;;  %v2704_v0 = vld [vmem:[#allocation7 + $0xe4] ss:$8 sps:$4 sm:$0xff]   ;;  %v2709_v1 = vld [vmem:[#allocation7 + $0x1d0] ss:$8 sps:$4 sm:$0xff]  }
  0x4c   :  { %v2712_v2 = vld [vmem:[#allocation7 + $0x1e4] ss:$8 sps:$4 sm:$0xff]   ;;  %v2708_v3 = vld [vmem:[#allocation7 + $0xe0] ss:$8 sps:$4 sm:$0xff]   ;;  %v2710_v4 = vld [vmem:[#allocation7 + $0xf4] ss:$8 sps:$4 sm:$0xff]  }
  0x4d   :  { %1980 = vmatpush1.bf16.msra.mxu1 %v2655_v29  ;;  %v2715_v5 = vld [vmem:[#allocation7 + $0x1e0] ss:$8 sps:$4 sm:$0xff]   ;;  %v2716_v6 = vld [vmem:[#allocation7 + $0x1f4] ss:$8 sps:$4 sm:$0xff]   ;;  %v2714_v7 = vld [vmem:[#allocation7 + $0xf0] ss:$8 sps:$4 sm:$0xff]  }
  0x4e   :  { %1981 = vmatprep.subr.bf16.mxu1 %v2658_v30  ;;  %1941 = vmatpush1.bf16.msra.mxu0 %v2654_v31  ;;  %v2720_v8 = vld [vmem:[#allocation7 + $0x204] ss:$8 sps:$4 sm:$0xff]   ;;  %v2721_v9 = vld [vmem:[#allocation7 + $0x1f0] ss:$8 sps:$4 sm:$0xff]   ;;  %v64_v12 = vshrl.u32 %v63_v11, 7  ;;  %s2309_s13 = sshll.u32 %s3157_s2, 4  ;;  %s2310_s13 = int_to_ptr.vmem [resolvable:$true] %s2309_s13 }
  0x4f   :  { %1942 = vmatprep.subr.bf16.mxu0 %v2656_v32  ;;  %v2727_v10 = vld [vmem:[#allocation7 + $0x304] ss:$8 sps:$4 sm:$0xff]   ;;  %v57_v15 = vld [vmem:[#allocation5] ss:$8 sm:$0x3]  ;;  %s3123_s14 = scalar_lea.vmem %s2310_s13, 256  ;;  %p3128_p11 = scmp.lt.s32.totalorder %s2310_s13, %s2310_s13 }
  0x50   :  { %v3243_v13 = vsub.s32 0, %v64_v12  ;;  %v3245_v14 = vsub.s32 1, %v64_v12  ;;  %v55_v16 = vld [vmem:[#allocation2] sm:$0xff]  ;;  %v59_v19 = vld [vmem:[#allocation5 + $0x1] ss:$8 sm:$0x3]  ;;  %p3124_p10 = scmp.ne.s32.totalorder %s2310_s13, %s3123_s14  ;;  %p3129_p12 = scmp.lt.s32.totalorder %s3123_s14, %s3123_s14 }
  0x51   :  { %1982 = vmatpush1.bf16.msra.mxu1 %v2661_v33  ;;  %v56_v20 = vld [vmem:[#allocation2 + $0x8] sm:$0xff]  ;;  %v2758_v12 = vld [vmem:[#allocation7 + $0x270] ss:$8 sps:$4 sm:$0xff]  }
  0x52   :  { %1983 = vmatprep.subr.bf16.mxu1 %v2664_v34  ;;  %1943 = vmatpush1.bf16.msra.mxu0 %v2660_v35  ;;  %v66_v17 = vrot.slane %v57_v15, %v3243_v13  ;;  %v70_v18 = vrot.slane %v57_v15, %v3245_v14  ;;  %v79_v22 = vrot.slane %v59_v19, %v3243_v13  ;;  %v2763_v11 = vld [vmem:[#allocation7 + $0x364] ss:$8 sps:$4 sm:$0xff]   ;;  %v2761_v15 = vld [vmem:[#allocation7 + $0x360] ss:$8 sps:$4 sm:$0xff]   ;;  %p3130_p13 = por %p3129_p12, %p3128_p11 }
  0x53   :  { %1944 = vmatprep.subr.bf16.mxu0 %v2662_v36  ;;  %v83_v24 = vrot.slane %v59_v19, %v3245_v14  ;;  %v2767_v19 = vld [vmem:[#allocation7 + $0x370] ss:$8 sps:$4 sm:$0xff]  }
  0x54   :  { %v73_v21 = vmul.f32 %v66_v17, %v55_v16  ;;  %v74_v23 = vmul.f32 %v70_v18, %v56_v20  ;;  %v2766_v16 = vld [vmem:[#allocation7 + $0x284] ss:$8 sps:$4 sm:$0xff]   ;;  %v2769_v17 = vld [vmem:[#allocation7 + $0x374] ss:$8 sps:$4 sm:$0xff]   ;;  %v2764_v18 = vld [vmem:[#allocation7 + $0x280] ss:$8 sps:$4 sm:$0xff]   ;;  %p3131_p0 = pnand %p3130_p13, %p3124_p10 }
  0x55   :  { %1984 = vmatpush1.bf16.msra.mxu1 %v2667_v37  ;;  %v2772_v20 = vld [vmem:[#allocation7 + $0x294] ss:$8 sps:$4 sm:$0xff]  }
  0x56   :  { %1985 = vmatprep.subr.bf16.mxu1 %v2670_v38  ;;  %1945 = vmatpush1.bf16.msra.mxu0 %v2666_v39  ;;  %v86_v25 = vadd.f32 %v79_v22, %v73_v21  ;;  %v87_v26 = vadd.f32 %v83_v24, %v74_v23  ;;  %v2775_v21 = vld [vmem:[#allocation7 + $0x384] ss:$8 sps:$4 sm:$0xff]   ;;  %v2770_v22 = vld [vmem:[#allocation7 + $0x290] ss:$8 sps:$4 sm:$0xff]   ;;  %v2773_v23 = vld [vmem:[#allocation7 + $0x380] ss:$8 sps:$4 sm:$0xff]  }
  0x57   :  { %1946 = vmatprep.subr.bf16.mxu0 %v2668_v40  ;;  %v2778_v24 = vld [vmem:[#allocation7 + $0x2a4] ss:$8 sps:$4 sm:$0xff]  }
  0x58   :  { %v3251_v27 = vmax.f32 %v86_v25, 0.0  ;;  %v3253_v28 = vmax.f32 %v87_v26, 0.0  ;;  %v2781_v25 = vld [vmem:[#allocation7 + $0x394] ss:$8 sps:$4 sm:$0xff]   ;;  %v2776_v26 = vld [vmem:[#allocation7 + $0x2a0] ss:$8 sps:$4 sm:$0xff]  }
  0x59   :  { %1986 = vmatpush1.bf16.msra.mxu1 %v2673_v41  ;;  %v2718_v41 = vld [vmem:[#allocation7 + $0x200] ss:$8 sps:$4 sm:$0xff]  }
  0x5a   :  { %1987 = vmatprep.subr.bf16.mxu1 %v2676_v42  ;;  %1947 = vmatpush1.bf16.msra.mxu0 %v2672_v43  ;;  %v90_v29 = vrot.slane %v3251_v27, 5  ;;  %v91_v30 = vrot.slane %v3253_v28, 5  ;;  %v112_v31 = vrot.slane %v3253_v28, 7  ;;  %v100_v34 = vrot.slane %v3251_v27, 6  ;;  %v2724_v42 = vld [vmem:[#allocation7 + $0x214] ss:$8 sps:$4 sm:$0xff]  }
  0x5b   :  { %1948 = vmatprep.subr.bf16.mxu0 %v2674_v44  ;;  %v101_v36 = vrot.slane %v3253_v28, 6 }
  0x5d   :  { %1988 = vmatpush1.bf16.msra.mxu1 %v2679_v45 }
  0x5e   :  { %1989 = vmatprep.subr.bf16.mxu1 %v2682_v46  ;;  %1949 = vmatpush1.bf16.msra.mxu0 %v2678_v47  ;;  %v2722_v47 = vld [vmem:[#allocation7 + $0x210] ss:$8 sps:$4 sm:$0xff]  }
  0x5f   :  { %1950 = vmatprep.subr.bf16.mxu0 %v2680_v48  ;;  %v2725_v48 = vld [vmem:[#allocation7 + $0x300] ss:$8 sps:$4 sm:$0xff]  }
  0x61   :  { %1990 = vmatpush1.bf16.msra.mxu1 %v2685_v49 }
  0x62   :  { %1991 = vmatprep.subr.bf16.mxu1 %v2688_v50  ;;  %1951 = vmatpush1.bf16.msra.mxu0 %v2684_v51  ;;  %v2730_v50 = vld [vmem:[#allocation7 + $0x224] ss:$8 sps:$4 sm:$0xff]   ;;  %v2733_v51 = vld [vmem:[#allocation7 + $0x314] ss:$8 sps:$4 sm:$0xff]  }
  0x63   :  { %1952 = vmatprep.subr.bf16.mxu0 %v2686_v52 }
  0x65   :  { %1992 = vmatpush1.bf16.msra.mxu1 %v2691_v53 }
  0x66   :  { %1993 = vmatprep.subr.bf16.mxu1 %v2694_v54  ;;  %1953 = vmatpush1.bf16.msra.mxu0 %v2690_v55 }
  0x67   :  { %1954 = vmatprep.subr.bf16.mxu0 %v2692_v56  ;;  %v2728_v56 = vld [vmem:[#allocation7 + $0x220] ss:$8 sps:$4 sm:$0xff]  }
  0x69   :  { %1994 = vmatpush1.bf16.msra.mxu1 %v2697_v57  ;;  %v2731_v57 = vld [vmem:[#allocation7 + $0x310] ss:$8 sps:$4 sm:$0xff]  }
  0x6a   :  { %1995 = vmatprep.subr.bf16.mxu1 %v2700_v58  ;;  %1955 = vmatpush1.bf16.msra.mxu0 %v2696_v59  ;;  %v2736_v58 = vld [vmem:[#allocation7 + $0x234] ss:$8 sps:$4 sm:$0xff]   ;;  %v2739_v59 = vld [vmem:[#allocation7 + $0x324] ss:$8 sps:$4 sm:$0xff]  }
  0x6b   :  { %1956 = vmatprep.subr.bf16.mxu0 %v2698_v60  ;;  %v2734_v60 = vld [vmem:[#allocation7 + $0x230] ss:$8 sps:$4 sm:$0xff]  }
  0x6d   :  { %1996 = vmatpush1.bf16.msra.mxu1 %v2703_v61  ;;  %v2737_v61 = vld [vmem:[#allocation7 + $0x320] ss:$8 sps:$4 sm:$0xff]  }
  0x6e   :  { %1997 = vmatprep.subr.bf16.mxu1 %v2706_v62  ;;  %1957 = vmatpush1.bf16.msra.mxu0 %v2702_v63  ;;  %v2742_v62 = vld [vmem:[#allocation7 + $0x244] ss:$8 sps:$4 sm:$0xff]   ;;  %v2745_v63 = vld [vmem:[#allocation7 + $0x334] ss:$8 sps:$4 sm:$0xff]  }
  0x6f   :  { %1958 = vmatprep.subr.bf16.mxu0 %v2704_v0  ;;  %v2740_v0 = vld [vmem:[#allocation7 + $0x240] ss:$8 sps:$4 sm:$0xff]  }
  0x71   :  { %1998 = vmatpush1.bf16.msra.mxu1 %v2709_v1  ;;  %v2743_v1 = vld [vmem:[#allocation7 + $0x330] ss:$8 sps:$4 sm:$0xff]  }
  0x72   :  { %1999 = vmatprep.subr.bf16.mxu1 %v2712_v2  ;;  %1959 = vmatpush1.bf16.msra.mxu0 %v2708_v3  ;;  %v2748_v2 = vld [vmem:[#allocation7 + $0x254] ss:$8 sps:$4 sm:$0xff]   ;;  %v2751_v3 = vld [vmem:[#allocation7 + $0x344] ss:$8 sps:$4 sm:$0xff]  }
  0x73   :  { %1960 = vmatprep.subr.bf16.mxu0 %v2710_v4  ;;  %v2746_v4 = vld [vmem:[#allocation7 + $0x250] ss:$8 sps:$4 sm:$0xff]  }
  0x75   :  { %2000 = vmatpush1.bf16.msra.mxu1 %v2715_v5  ;;  %v2749_v5 = vld [vmem:[#allocation7 + $0x340] ss:$8 sps:$4 sm:$0xff]  }
  0x76   :  { %2001 = vmatprep.subr.bf16.mxu1 %v2716_v6  ;;  %1961 = vmatpush1.bf16.msra.mxu0 %v2714_v7  ;;  %v2754_v6 = vld [vmem:[#allocation7 + $0x264] ss:$8 sps:$4 sm:$0xff]   ;;  %v2757_v7 = vld [vmem:[#allocation7 + $0x354] ss:$8 sps:$4 sm:$0xff]  }
  0x77   :  { %2012 = vmatprep.subr.bf16.mxu0 %v2720_v8  ;;  %v2752_v8 = vld [vmem:[#allocation7 + $0x260] ss:$8 sps:$4 sm:$0xff]  }
  0x79   :  { %2002 = vmatpush1.bf16.msra.mxu1 %v2721_v9  ;;  %v2755_v9 = vld [vmem:[#allocation7 + $0x350] ss:$8 sps:$4 sm:$0xff]  }
  0x7a   :  { %2053 = vmatprep.subr.bf16.mxu1 %v2727_v10  ;;  %v2760_v10 = vld [vmem:[#allocation7 + $0x274] ss:$8 sps:$4 sm:$0xff]  }
  0xb7   :  { %v96_v32 = vpop.permute.xlu0 %95  ;;  %v3260_v37 = vpop.permute.xlu1 %117 }
  0xb8   :  { %v98_v33 = vmul.f32 %v96_v32, %v90_v29  ;;  %v99_v35 = vmul.f32 %v96_v32, %v91_v30  ;;  %v121_v38 = vmul.f32 %v3260_v37, %v112_v31  ;;  %v2779_v29 = vld [vmem:[#allocation7 + $0x390] ss:$8 sps:$4 sm:$0xff]   ;;  %v2784_v30 = vld [vmem:[#allocation7 + $0x2b4] ss:$8 sps:$4 sm:$0xff]  }
  0xb9   :  { %v2782_v32 = vld [vmem:[#allocation7 + $0x2b0] ss:$8 sps:$4 sm:$0xff]  }
  0xba   :  { %v173_v39 = vpack.c.bf16 %v98_v33, %v98_v33  ;;  %v174_v40 = vpack.c.bf16 %v99_v35, %v99_v35  ;;  %v178_v44 = vpack.c.bf16 %v121_v38, %v121_v38  ;;  %v2785_v33 = vld [vmem:[#allocation7 + $0x3a0] ss:$8 sps:$4 sm:$0xff]   ;;  %v2793_v35 = vld [vmem:[#allocation7 + $0x3b4] ss:$8 sps:$4 sm:$0xff]   ;;  %v2791_v38 = vld [vmem:[#allocation7 + $0x3b0] ss:$8 sps:$4 sm:$0xff]  }
  0xbb   :  { %v107_v43 = vpop.permute.xlu0 %106  ;;  %v3263_v49 = vpop.permute.xlu1 %126 }
  0xbc   :  { %v109_v45 = vmul.f32 %v107_v43, %v100_v34  ;;  %1962 = vmatprep.mubr.bf16.mxu0 %v174_v40  ;;  %v110_v46 = vmul.f32 %v107_v43, %v101_v36  ;;  %v130_v52 = vmul.f32 %v3263_v49, %v112_v31  ;;  %v2787_v31 = vld [vmem:[#allocation7 + $0x3a4] ss:$8 sps:$4 sm:$0xff]   ;;  %v2788_v36 = vld [vmem:[#allocation7 + $0x2c0] ss:$8 sps:$4 sm:$0xff]  }
  0xbd   :  { %1963 = vmatmul.mubr.bf16.vlgmr.msra.gmra.mrb[0].mxu0 %v173_v39  ;;  %v2790_v34 = vld [vmem:[#allocation7 + $0x2c4] ss:$8 sps:$4 sm:$0xff]   ;;  %v2796_v39 = vld [vmem:[#allocation7 + $0x2d4] ss:$8 sps:$4 sm:$0xff]  }
  0xbe   :  { %v175_v53 = vpack.c.bf16 %v109_v45, %v109_v45  ;;  %2013 = vmatpush1.bf16.msra.mxu0 %v2718_v41  ;;  %v176_v54 = vpack.c.bf16 %v110_v46, %v110_v46  ;;  %2044 = vmatprep.mubr.bf16.mxu0 %v178_v44  ;;  %v180_v55 = vpack.c.bf16 %v130_v52, %v130_v52  ;;  %v2799_v40 = vld [vmem:[#allocation7 + $0x3c4] ss:$8 sps:$4 sm:$0xff]   ;;  %v2794_v41 = vld [vmem:[#allocation7 + $0x2d0] ss:$8 sps:$4 sm:$0xff]   ;;  %v2805_v44 = vld [vmem:[#allocation7 + $0x3d4] ss:$8 sps:$4 sm:$0xff]  }
  0xbf   :  { %2014 = vmatprep.subr.bf16.mxu0 %v2724_v42  ;;  %v2797_v42 = vld [vmem:[#allocation7 + $0x3c0] ss:$8 sps:$4 sm:$0xff]   ;;  %v2802_v43 = vld [vmem:[#allocation7 + $0x2e4] ss:$8 sps:$4 sm:$0xff]   ;;  %v111_v45 = vrot.slane %v3251_v27, 7 }
  0xc0   :  { %2003 = vmatprep.mubr.bf16.mxu1 %v176_v54  ;;  %v2800_v46 = vld [vmem:[#allocation7 + $0x2e0] ss:$8 sps:$4 sm:$0xff]   ;;  %v2806_v52 = vld [vmem:[#allocation7 + $0x2f0] ss:$8 sps:$4 sm:$0xff]   ;;  %v2814_v54 = vld [vmem:[#allocation7 + $0x3f4] ss:$8 sps:$4 sm:$0xff]  }
  0xc1   :  { %2004 = vmatmul.mubr.bf16.vlgmr.msra.gmra.mrb[0].mxu1 %v175_v53  ;;  %v2809_v53 = vld [vmem:[#allocation7 + $0x3e0] ss:$8 sps:$4 sm:$0xff]  }
  0xc2   :  { %2015 = vmatpush1.bf16.msra.mxu0 %v2722_v47  ;;  %2054 = vmatpush1.bf16.msra.mxu1 %v2725_v48  ;;  %v2803_v47 = vld [vmem:[#allocation7 + $0x3d0] ss:$8 sps:$4 sm:$0xff]   ;;  %v2808_v48 = vld [vmem:[#allocation7 + $0x2f4] ss:$8 sps:$4 sm:$0xff]  }
  0xc3   :  { %2016 = vmatprep.subr.bf16.mxu0 %v2730_v50  ;;  %2055 = vmatprep.subr.bf16.mxu1 %v2733_v51  ;;  %v2811_v50 = vld [vmem:[#allocation7 + $0x3e4] ss:$8 sps:$4 sm:$0xff]   ;;  %v120_v51 = vmul.f32 %v3260_v37, %v111_v45  ;;  %v2820_v37 = vld [vmem:[#allocation7 + $0x414] ss:$8 sps:$4 sm:$0xff]  }
  0xc4   :  { %2085 = vmatprep.mubr.bf16.mxu1 %v180_v55  ;;  %v2817_v55 = vld [vmem:[#allocation7 + $0x404] ss:$8 sps:$4 sm:$0xff]  }
  0xc6   :  { %2017 = vmatpush1.bf16.msra.mxu0 %v2728_v56  ;;  %2056 = vmatpush1.bf16.msra.mxu1 %v2731_v57  ;;  %v132_v56 = vrot.slane %v3253_v28, 1  ;;  %v177_v57 = vpack.c.bf16 %v120_v51, %v120_v51  ;;  %v2889_v51 = vld [vmem:[#allocation7 + $0x5b4] ss:$8 sps:$4 sm:$0xff]  }
  0xc7   :  { %2018 = vmatprep.subr.bf16.mxu0 %v2736_v58  ;;  %2057 = vmatprep.subr.bf16.mxu1 %v2739_v59  ;;  %v3269_v58 = vpop.permute.xlu0 %137  ;;  %v2812_v59 = vld [vmem:[#allocation7 + $0x3f0] ss:$8 sps:$4 sm:$0xff]  }
  0xca   :  { %2019 = vmatpush1.bf16.msra.mxu0 %v2734_v60  ;;  %2058 = vmatpush1.bf16.msra.mxu1 %v2737_v61  ;;  %v2815_v60 = vld [vmem:[#allocation7 + $0x400] ss:$8 sps:$4 sm:$0xff]   ;;  %v129_v61 = vmul.f32 %v3263_v49, %v111_v45  ;;  %v2826_v49 = vld [vmem:[#allocation7 + $0x424] ss:$8 sps:$4 sm:$0xff]   ;;  %v2880_v45 = vld [vmem:[#allocation7 + $0x4b4] ss:$8 sps:$4 sm:$0xff]  }
  0xcb   :  { %2020 = vmatprep.subr.bf16.mxu0 %v2742_v62  ;;  %2059 = vmatprep.subr.bf16.mxu1 %v2745_v63  ;;  %v2823_v62 = vld [vmem:[#allocation7 + $0x504] ss:$8 sps:$4 sm:$0xff]   ;;  %v182_v63 = vpack.c.bf16 %v3253_v28, %v3253_v28 }
  0xce   :  { %2021 = vmatpush1.bf16.msra.mxu0 %v2740_v0  ;;  %2060 = vmatpush1.bf16.msra.mxu1 %v2743_v1  ;;  %v141_v0 = vmul.f32 %v3269_v58, %v132_v56  ;;  %v2818_v1 = vld [vmem:[#allocation7 + $0x410] ss:$8 sps:$4 sm:$0xff]  }
  0xcf   :  { %2022 = vmatprep.subr.bf16.mxu0 %v2748_v2  ;;  %2061 = vmatprep.subr.bf16.mxu1 %v2751_v3  ;;  %v2821_v2 = vld [vmem:[#allocation7 + $0x500] ss:$8 sps:$4 sm:$0xff]   ;;  %v179_v3 = vpack.c.bf16 %v129_v61, %v129_v61  ;;  %v2901_v61 = vld [vmem:[#allocation7 + $0x5d4] ss:$8 sps:$4 sm:$0xff]  }
  0xd2   :  { %2023 = vmatpush1.bf16.msra.mxu0 %v2746_v4  ;;  %2062 = vmatpush1.bf16.msra.mxu1 %v2749_v5  ;;  %v2829_v4 = vld [vmem:[#allocation7 + $0x514] ss:$8 sps:$4 sm:$0xff]   ;;  %v184_v5 = vpack.c.bf16 %v141_v0, %v141_v0  ;;  %v2907_v0 = vld [vmem:[#allocation7 + $0x5e4] ss:$8 sps:$4 sm:$0xff]  }
  0xd3   :  { %2024 = vmatprep.subr.bf16.mxu0 %v2754_v6  ;;  %2063 = vmatprep.subr.bf16.mxu1 %v2757_v7  ;;  %v2824_v6 = vld [vmem:[#allocation7 + $0x420] ss:$8 sps:$4 sm:$0xff]   ;;  %v2827_v7 = vld [vmem:[#allocation7 + $0x510] ss:$8 sps:$4 sm:$0xff]  }
  0xd6   :  { %2025 = vmatpush1.bf16.msra.mxu0 %v2752_v8  ;;  %2064 = vmatpush1.bf16.msra.mxu1 %v2755_v9  ;;  %v2832_v8 = vld [vmem:[#allocation7 + $0x434] ss:$8 sps:$4 sm:$0xff]   ;;  %v2835_v9 = vld [vmem:[#allocation7 + $0x524] ss:$8 sps:$4 sm:$0xff]  }
  0xd7   :  { %2026 = vmatprep.subr.bf16.mxu0 %v2760_v10  ;;  %2065 = vmatprep.subr.bf16.mxu1 %v2763_v11  ;;  %v2830_v10 = vld [vmem:[#allocation7 + $0x430] ss:$8 sps:$4 sm:$0xff]   ;;  %v2833_v11 = vld [vmem:[#allocation7 + $0x520] ss:$8 sps:$4 sm:$0xff]  }
  0xda   :  { %2027 = vmatpush1.bf16.msra.mxu0 %v2758_v12  ;;  %2066 = vmatpush1.bf16.msra.mxu1 %v2761_v15  ;;  %v2838_v12 = vld [vmem:[#allocation7 + $0x444] ss:$8 sps:$4 sm:$0xff]   ;;  %v2841_v15 = vld [vmem:[#allocation7 + $0x534] ss:$8 sps:$4 sm:$0xff]  }
  0xdb   :  { %2028 = vmatprep.subr.bf16.mxu0 %v2766_v16  ;;  %2067 = vmatprep.subr.bf16.mxu1 %v2769_v17  ;;  %v2836_v16 = vld [vmem:[#allocation7 + $0x440] ss:$8 sps:$4 sm:$0xff]   ;;  %v2839_v17 = vld [vmem:[#allocation7 + $0x530] ss:$8 sps:$4 sm:$0xff]  }
  0xde   :  { %2029 = vmatpush1.bf16.msra.mxu0 %v2764_v18  ;;  %2068 = vmatpush1.bf16.msra.mxu1 %v2767_v19  ;;  %v2844_v18 = vld [vmem:[#allocation7 + $0x454] ss:$8 sps:$4 sm:$0xff]   ;;  %v2847_v19 = vld [vmem:[#allocation7 + $0x544] ss:$8 sps:$4 sm:$0xff]  }
  0xdf   :  { %2030 = vmatprep.subr.bf16.mxu0 %v2772_v20  ;;  %2069 = vmatprep.subr.bf16.mxu1 %v2775_v21  ;;  %v2842_v20 = vld [vmem:[#allocation7 + $0x450] ss:$8 sps:$4 sm:$0xff]   ;;  %v2845_v21 = vld [vmem:[#allocation7 + $0x540] ss:$8 sps:$4 sm:$0xff]  }
  0xe2   :  { %2031 = vmatpush1.bf16.msra.mxu0 %v2770_v22  ;;  %2070 = vmatpush1.bf16.msra.mxu1 %v2773_v23  ;;  %v2850_v22 = vld [vmem:[#allocation7 + $0x464] ss:$8 sps:$4 sm:$0xff]   ;;  %v2853_v23 = vld [vmem:[#allocation7 + $0x554] ss:$8 sps:$4 sm:$0xff]  }
  0xe3   :  { %2032 = vmatprep.subr.bf16.mxu0 %v2778_v24  ;;  %2071 = vmatprep.subr.bf16.mxu1 %v2781_v25  ;;  %v2848_v24 = vld [vmem:[#allocation7 + $0x460] ss:$8 sps:$4 sm:$0xff]   ;;  %v2851_v25 = vld [vmem:[#allocation7 + $0x550] ss:$8 sps:$4 sm:$0xff]  }
  0xe6   :  { %2033 = vmatpush1.bf16.msra.mxu0 %v2776_v26  ;;  %2072 = vmatpush1.bf16.msra.mxu1 %v2779_v29  ;;  %v2856_v26 = vld [vmem:[#allocation7 + $0x474] ss:$8 sps:$4 sm:$0xff]   ;;  %v2859_v29 = vld [vmem:[#allocation7 + $0x564] ss:$8 sps:$4 sm:$0xff]  }
  0xe7   :  { %2034 = vmatprep.subr.bf16.mxu0 %v2784_v30  ;;  %2073 = vmatprep.subr.bf16.mxu1 %v2787_v31  ;;  %v2854_v30 = vld [vmem:[#allocation7 + $0x470] ss:$8 sps:$4 sm:$0xff]   ;;  %v2857_v31 = vld [vmem:[#allocation7 + $0x560] ss:$8 sps:$4 sm:$0xff]  }
  0xea   :  { %2035 = vmatpush1.bf16.msra.mxu0 %v2782_v32  ;;  %2074 = vmatpush1.bf16.msra.mxu1 %v2785_v33  ;;  %v2862_v32 = vld [vmem:[#allocation7 + $0x484] ss:$8 sps:$4 sm:$0xff]   ;;  %v2865_v33 = vld [vmem:[#allocation7 + $0x574] ss:$8 sps:$4 sm:$0xff]  }
  0xeb   :  { %2036 = vmatprep.subr.bf16.mxu0 %v2790_v34  ;;  %2075 = vmatprep.subr.bf16.mxu1 %v2793_v35  ;;  %v2860_v34 = vld [vmem:[#allocation7 + $0x480] ss:$8 sps:$4 sm:$0xff]   ;;  %v2863_v35 = vld [vmem:[#allocation7 + $0x570] ss:$8 sps:$4 sm:$0xff]  }
  0xee   :  { %2037 = vmatpush1.bf16.msra.mxu0 %v2788_v36  ;;  %2076 = vmatpush1.bf16.msra.mxu1 %v2791_v38  ;;  %v2868_v36 = vld [vmem:[#allocation7 + $0x494] ss:$8 sps:$4 sm:$0xff]   ;;  %v2871_v38 = vld [vmem:[#allocation7 + $0x584] ss:$8 sps:$4 sm:$0xff]  }
  0xef   :  { %2038 = vmatprep.subr.bf16.mxu0 %v2796_v39  ;;  %2077 = vmatprep.subr.bf16.mxu1 %v2799_v40  ;;  %v2866_v39 = vld [vmem:[#allocation7 + $0x490] ss:$8 sps:$4 sm:$0xff]   ;;  %v2869_v40 = vld [vmem:[#allocation7 + $0x580] ss:$8 sps:$4 sm:$0xff]  }
  0xf2   :  { %2039 = vmatpush1.bf16.msra.mxu0 %v2794_v41  ;;  %2078 = vmatpush1.bf16.msra.mxu1 %v2797_v42  ;;  %v2874_v41 = vld [vmem:[#allocation7 + $0x4a4] ss:$8 sps:$4 sm:$0xff]   ;;  %v2877_v42 = vld [vmem:[#allocation7 + $0x594] ss:$8 sps:$4 sm:$0xff]  }
  0xf3   :  { %2040 = vmatprep.subr.bf16.mxu0 %v2802_v43  ;;  %2079 = vmatprep.subr.bf16.mxu1 %v2805_v44  ;;  %v2872_v43 = vld [vmem:[#allocation7 + $0x4a0] ss:$8 sps:$4 sm:$0xff]   ;;  %v2875_v44 = vld [vmem:[#allocation7 + $0x590] ss:$8 sps:$4 sm:$0xff]  }
  0xf6   :  { %2041 = vmatpush1.bf16.msra.mxu0 %v2800_v46  ;;  %2080 = vmatpush1.bf16.msra.mxu1 %v2803_v47  ;;  %v2883_v46 = vld [vmem:[#allocation7 + $0x5a4] ss:$8 sps:$4 sm:$0xff]   ;;  %v2878_v47 = vld [vmem:[#allocation7 + $0x4b0] ss:$8 sps:$4 sm:$0xff]  }
  0xf7   :  { %2042 = vmatprep.subr.bf16.mxu0 %v2808_v48  ;;  %2081 = vmatprep.subr.bf16.mxu1 %v2811_v50  ;;  %v2881_v48 = vld [vmem:[#allocation7 + $0x5a0] ss:$8 sps:$4 sm:$0xff]   ;;  %v2886_v50 = vld [vmem:[#allocation7 + $0x4c4] ss:$8 sps:$4 sm:$0xff]  }
  0xfa   :  { %2043 = vmatpush1.bf16.msra.mxu0 %v2806_v52  ;;  %2082 = vmatpush1.bf16.msra.mxu1 %v2809_v53  ;;  %v2884_v52 = vld [vmem:[#allocation7 + $0x4c0] ss:$8 sps:$4 sm:$0xff]   ;;  %v2887_v53 = vld [vmem:[#allocation7 + $0x5b0] ss:$8 sps:$4 sm:$0xff]  }
  0xfb   :  { %2083 = vmatprep.subr.bf16.mxu1 %v2814_v54  ;;  %2094 = vmatprep.subr.bf16.mxu0 %v2817_v55  ;;  %v2892_v54 = vld [vmem:[#allocation7 + $0x4d4] ss:$8 sps:$4 sm:$0xff]   ;;  %v2895_v55 = vld [vmem:[#allocation7 + $0x5c4] ss:$8 sps:$4 sm:$0xff]  }
  0xfd   :  { %2045 = vmatmul.mubr.bf16.vlgmr.msra.gmra.mrb[4].mxu0 %v177_v57  ;;  %v2890_v57 = vld [vmem:[#allocation7 + $0x4d0] ss:$8 sps:$4 sm:$0xff]  }
  0xfe   :  { %2084 = vmatpush1.bf16.msra.mxu1 %v2812_v59  ;;  %2095 = vmatpush1.bf16.msra.mxu0 %v2815_v60  ;;  %v2893_v59 = vld [vmem:[#allocation7 + $0x5c0] ss:$8 sps:$4 sm:$0xff]   ;;  %v2898_v60 = vld [vmem:[#allocation7 + $0x4e4] ss:$8 sps:$4 sm:$0xff]  }
  0xff   :  { %2096 = vmatprep.subr.bf16.mxu0 %v2820_v37  ;;  %2135 = vmatprep.subr.bf16.mxu1 %v2823_v62  ;;  %v2896_v37 = vld [vmem:[#allocation7 + $0x4e0] ss:$8 sps:$4 sm:$0xff]   ;;  %v2899_v62 = vld [vmem:[#allocation7 + $0x5d0] ss:$8 sps:$4 sm:$0xff]  }
 0x100   :  { %2126 = vmatprep.mubr.bf16.mxu0 %v182_v63  ;;  %v2904_v63 = vld [vmem:[#allocation7 + $0x4f4] ss:$8 sps:$4 sm:$0xff]  }
 0x101   :  { %2086 = vmatmul.mubr.bf16.vlgmr.msra.gmra.mrb[4].mxu1 %v179_v3  ;;  %v131_v3 = vrot.slane %v3251_v27, 1 }
 0x102   :  { %2097 = vmatpush1.bf16.msra.mxu0 %v2818_v1  ;;  %2136 = vmatpush1.bf16.msra.mxu1 %v2821_v2  ;;  %v2902_v1 = vld [vmem:[#allocation7 + $0x4f0] ss:$8 sps:$4 sm:$0xff]   ;;  %v2905_v2 = vld [vmem:[#allocation7 + $0x5e0] ss:$8 sps:$4 sm:$0xff]  }
 0x103   :  { %2167 = vmatprep.mubr.bf16.mxu1 %v184_v5  ;;  %2098 = vmatprep.subr.bf16.mxu0 %v2826_v49  ;;  %v2910_v49 = vld [vmem:[#allocation7 + $0x5f4] ss:$8 sps:$4 sm:$0xff]   ;;  %v3278_v5 = vpop.permute.xlu1 %146 }
 0x104   :  { %2137 = vmatprep.subr.bf16.mxu1 %v2829_v4  ;;  %v2913_v4 = vld [vmem:[#allocation7 + $0x604] ss:$8 sps:$4 sm:$0xff]  }
 0x106   :  { %2099 = vmatpush1.bf16.msra.mxu0 %v2824_v6  ;;  %2138 = vmatpush1.bf16.msra.mxu1 %v2827_v7  ;;  %v152_v6 = vrot.slane %v3253_v28, 2  ;;  %v150_v7 = vmul.f32 %v3278_v5, %v132_v56 }
 0x107   :  { %2100 = vmatprep.subr.bf16.mxu0 %v2832_v8  ;;  %2139 = vmatprep.subr.bf16.mxu1 %v2835_v9  ;;  %v181_v8 = vpack.c.bf16 %v3251_v27, %v3251_v27  ;;  %v3286_v9 = vpop.permute.xlu0 %157 }
 0x108   :  { %v186_v56 = vpack.c.bf16 %v150_v7, %v150_v7  ;;  %v2988_v7 = vld [vmem:[#allocation7 + $0x6d4] ss:$8 sps:$4 sm:$0xff]  }
 0x10a   :  { %2101 = vmatpush1.bf16.msra.mxu0 %v2830_v10  ;;  %2140 = vmatpush1.bf16.msra.mxu1 %v2833_v11  ;;  %v2908_v10 = vld [vmem:[#allocation7 + $0x5f0] ss:$8 sps:$4 sm:$0xff]   ;;  %v2911_v11 = vld [vmem:[#allocation7 + $0x600] ss:$8 sps:$4 sm:$0xff]  }
 0x10b   :  { %2102 = vmatprep.subr.bf16.mxu0 %v2838_v12  ;;  %2141 = vmatprep.subr.bf16.mxu1 %v2841_v15  ;;  %v140_v12 = vmul.f32 %v3269_v58, %v131_v3  ;;  %v2916_v15 = vld [vmem:[#allocation7 + $0x614] ss:$8 sps:$4 sm:$0xff]   ;;  %v2920_v58 = vld [vmem:[#allocation7 + $0x620] ss:$8 sps:$4 sm:$0xff]  }
 0x10e   :  { %2103 = vmatpush1.bf16.msra.mxu0 %v2836_v16  ;;  %2142 = vmatpush1.bf16.msra.mxu1 %v2839_v17  ;;  %v2919_v16 = vld [vmem:[#allocation7 + $0x704] ss:$8 sps:$4 sm:$0xff]   ;;  %v161_v17 = vmul.f32 %v3286_v9, %v152_v6  ;;  %v2983_v6 = vld [vmem:[#allocation7 + $0x7b0] ss:$8 sps:$4 sm:$0xff]  }
 0x10f   :  { %2104 = vmatprep.subr.bf16.mxu0 %v2844_v18  ;;  %2143 = vmatprep.subr.bf16.mxu1 %v2847_v19  ;;  %v2914_v18 = vld [vmem:[#allocation7 + $0x610] ss:$8 sps:$4 sm:$0xff]   ;;  %v2917_v19 = vld [vmem:[#allocation7 + $0x700] ss:$8 sps:$4 sm:$0xff]  }
 0x112   :  { %2105 = vmatpush1.bf16.msra.mxu0 %v2842_v20  ;;  %2144 = vmatpush1.bf16.msra.mxu1 %v2845_v21  ;;  %v183_v20 = vpack.c.bf16 %v140_v12, %v140_v12  ;;  %v2922_v21 = vld [vmem:[#allocation7 + $0x624] ss:$8 sps:$4 sm:$0xff]  }
 0x113   :  { %2106 = vmatprep.subr.bf16.mxu0 %v2850_v22  ;;  %2145 = vmatprep.subr.bf16.mxu1 %v2853_v23  ;;  %v2925_v22 = vld [vmem:[#allocation7 + $0x714] ss:$8 sps:$4 sm:$0xff]   ;;  %v188_v23 = vpack.c.bf16 %v161_v17, %v161_v17  ;;  %v2994_v12 = vld [vmem:[#allocation7 + $0x6e4] ss:$8 sps:$4 sm:$0xff]   ;;  %v2995_v17 = vld [vmem:[#allocation7 + $0x7d0] ss:$8 sps:$4 sm:$0xff]  }
 0x116   :  { %2107 = vmatpush1.bf16.msra.mxu0 %v2848_v24  ;;  %2146 = vmatpush1.bf16.msra.mxu1 %v2851_v25  ;;  %v2923_v24 = vld [vmem:[#allocation7 + $0x710] ss:$8 sps:$4 sm:$0xff]   ;;  %v2928_v25 = vld [vmem:[#allocation7 + $0x634] ss:$8 sps:$4 sm:$0xff]  }
 0x117   :  { %2108 = vmatprep.subr.bf16.mxu0 %v2856_v26  ;;  %2147 = vmatprep.subr.bf16.mxu1 %v2859_v29  ;;  %v2931_v26 = vld [vmem:[#allocation7 + $0x724] ss:$8 sps:$4 sm:$0xff]   ;;  %v2926_v29 = vld [vmem:[#allocation7 + $0x630] ss:$8 sps:$4 sm:$0xff]  }
 0x11a   :  { %2109 = vmatpush1.bf16.msra.mxu0 %v2854_v30  ;;  %2148 = vmatpush1.bf16.msra.mxu1 %v2857_v31  ;;  %v2929_v30 = vld [vmem:[#allocation7 + $0x720] ss:$8 sps:$4 sm:$0xff]   ;;  %v2934_v31 = vld [vmem:[#allocation7 + $0x644] ss:$8 sps:$4 sm:$0xff]  }
 0x11b   :  { %2110 = vmatprep.subr.bf16.mxu0 %v2862_v32  ;;  %2149 = vmatprep.subr.bf16.mxu1 %v2865_v33  ;;  %v2937_v32 = vld [vmem:[#allocation7 + $0x734] ss:$8 sps:$4 sm:$0xff]   ;;  %v2932_v33 = vld [vmem:[#allocation7 + $0x640] ss:$8 sps:$4 sm:$0xff]  }
 0x11e   :  { %2111 = vmatpush1.bf16.msra.mxu0 %v2860_v34  ;;  %2150 = vmatpush1.bf16.msra.mxu1 %v2863_v35  ;;  %v2935_v34 = vld [vmem:[#allocation7 + $0x730] ss:$8 sps:$4 sm:$0xff]   ;;  %v2940_v35 = vld [vmem:[#allocation7 + $0x654] ss:$8 sps:$4 sm:$0xff]  }
 0x11f   :  { %2112 = vmatprep.subr.bf16.mxu0 %v2868_v36  ;;  %2151 = vmatprep.subr.bf16.mxu1 %v2871_v38  ;;  %v2943_v36 = vld [vmem:[#allocation7 + $0x744] ss:$8 sps:$4 sm:$0xff]   ;;  %v2938_v38 = vld [vmem:[#allocation7 + $0x650] ss:$8 sps:$4 sm:$0xff]  }
 0x122   :  { %2113 = vmatpush1.bf16.msra.mxu0 %v2866_v39  ;;  %2152 = vmatpush1.bf16.msra.mxu1 %v2869_v40  ;;  %v2941_v39 = vld [vmem:[#allocation7 + $0x740] ss:$8 sps:$4 sm:$0xff]   ;;  %v2946_v40 = vld [vmem:[#allocation7 + $0x664] ss:$8 sps:$4 sm:$0xff]  }
 0x123   :  { %2114 = vmatprep.subr.bf16.mxu0 %v2874_v41  ;;  %2153 = vmatprep.subr.bf16.mxu1 %v2877_v42  ;;  %v2949_v41 = vld [vmem:[#allocation7 + $0x754] ss:$8 sps:$4 sm:$0xff]   ;;  %v2944_v42 = vld [vmem:[#allocation7 + $0x660] ss:$8 sps:$4 sm:$0xff]  }
 0x126   :  { %2115 = vmatpush1.bf16.msra.mxu0 %v2872_v43  ;;  %2154 = vmatpush1.bf16.msra.mxu1 %v2875_v44  ;;  %v2947_v43 = vld [vmem:[#allocation7 + $0x750] ss:$8 sps:$4 sm:$0xff]   ;;  %v2952_v44 = vld [vmem:[#allocation7 + $0x674] ss:$8 sps:$4 sm:$0xff]  }
 0x127   :  { %2116 = vmatprep.subr.bf16.mxu0 %v2880_v45  ;;  %2155 = vmatprep.subr.bf16.mxu1 %v2883_v46  ;;  %v2955_v45 = vld [vmem:[#allocation7 + $0x764] ss:$8 sps:$4 sm:$0xff]   ;;  %v2950_v46 = vld [vmem:[#allocation7 + $0x670] ss:$8 sps:$4 sm:$0xff]  }
 0x12a   :  { %2117 = vmatpush1.bf16.msra.mxu0 %v2878_v47  ;;  %2156 = vmatpush1.bf16.msra.mxu1 %v2881_v48  ;;  %v2953_v47 = vld [vmem:[#allocation7 + $0x760] ss:$8 sps:$4 sm:$0xff]   ;;  %v2958_v48 = vld [vmem:[#allocation7 + $0x684] ss:$8 sps:$4 sm:$0xff]  }
 0x12b   :  { %2118 = vmatprep.subr.bf16.mxu0 %v2886_v50  ;;  %2157 = vmatprep.subr.bf16.mxu1 %v2889_v51  ;;  %v2961_v50 = vld [vmem:[#allocation7 + $0x774] ss:$8 sps:$4 sm:$0xff]   ;;  %v2956_v51 = vld [vmem:[#allocation7 + $0x680] ss:$8 sps:$4 sm:$0xff]  }
 0x12e   :  { %2119 = vmatpush1.bf16.msra.mxu0 %v2884_v52  ;;  %2158 = vmatpush1.bf16.msra.mxu1 %v2887_v53  ;;  %v2959_v52 = vld [vmem:[#allocation7 + $0x770] ss:$8 sps:$4 sm:$0xff]   ;;  %v2964_v53 = vld [vmem:[#allocation7 + $0x694] ss:$8 sps:$4 sm:$0xff]  }
 0x12f   :  { %2120 = vmatprep.subr.bf16.mxu0 %v2892_v54  ;;  %2159 = vmatprep.subr.bf16.mxu1 %v2895_v55  ;;  %v2967_v54 = vld [vmem:[#allocation7 + $0x784] ss:$8 sps:$4 sm:$0xff]   ;;  %v2962_v55 = vld [vmem:[#allocation7 + $0x690] ss:$8 sps:$4 sm:$0xff]  }
 0x132   :  { %2121 = vmatpush1.bf16.msra.mxu0 %v2890_v57  ;;  %2160 = vmatpush1.bf16.msra.mxu1 %v2893_v59  ;;  %v2965_v57 = vld [vmem:[#allocation7 + $0x780] ss:$8 sps:$4 sm:$0xff]   ;;  %v2970_v59 = vld [vmem:[#allocation7 + $0x6a4] ss:$8 sps:$4 sm:$0xff]  }
 0x133   :  { %2122 = vmatprep.subr.bf16.mxu0 %v2898_v60  ;;  %2161 = vmatprep.subr.bf16.mxu1 %v2901_v61  ;;  %v2973_v60 = vld [vmem:[#allocation7 + $0x794] ss:$8 sps:$4 sm:$0xff]   ;;  %v2968_v61 = vld [vmem:[#allocation7 + $0x6a0] ss:$8 sps:$4 sm:$0xff]  }
 0x136   :  { %2123 = vmatpush1.bf16.msra.mxu0 %v2896_v37  ;;  %2162 = vmatpush1.bf16.msra.mxu1 %v2899_v62  ;;  %v2971_v37 = vld [vmem:[#allocation7 + $0x790] ss:$8 sps:$4 sm:$0xff]   ;;  %v2976_v62 = vld [vmem:[#allocation7 + $0x6b4] ss:$8 sps:$4 sm:$0xff]  }
 0x137   :  { %2124 = vmatprep.subr.bf16.mxu0 %v2904_v63  ;;  %2163 = vmatprep.subr.bf16.mxu1 %v2907_v0  ;;  %v2979_v63 = vld [vmem:[#allocation7 + $0x7a4] ss:$8 sps:$4 sm:$0xff]   ;;  %v2974_v0 = vld [vmem:[#allocation7 + $0x6b0] ss:$8 sps:$4 sm:$0xff]  }
 0x13a   :  { %2125 = vmatpush1.bf16.msra.mxu0 %v2902_v1  ;;  %2164 = vmatpush1.bf16.msra.mxu1 %v2905_v2  ;;  %v2977_v1 = vld [vmem:[#allocation7 + $0x7a0] ss:$8 sps:$4 sm:$0xff]   ;;  %v2982_v2 = vld [vmem:[#allocation7 + $0x6c4] ss:$8 sps:$4 sm:$0xff]  }
 0x13b   :  { %2165 = vmatprep.subr.bf16.mxu1 %v2910_v49  ;;  %2176 = vmatprep.subr.bf16.mxu0 %v2913_v4  ;;  %v2985_v49 = vld [vmem:[#allocation7 + $0x7b4] ss:$8 sps:$4 sm:$0xff]   ;;  %v2980_v4 = vld [vmem:[#allocation7 + $0x6c0] ss:$8 sps:$4 sm:$0xff]  }
 0x13d   :  { %2127 = vmatmul.mubr.bf16.vlgmr.msra.gmra.mrb[8].mxu0 %v181_v8  ;;  %v2991_v8 = vld [vmem:[#allocation7 + $0x7c4] ss:$8 sps:$4 sm:$0xff]  }
 0x13e   :  { %2166 = vmatpush1.bf16.msra.mxu1 %v2908_v10  ;;  %2177 = vmatpush1.bf16.msra.mxu0 %v2911_v11  ;;  %v2986_v10 = vld [vmem:[#allocation7 + $0x6d0] ss:$8 sps:$4 sm:$0xff]   ;;  %v2989_v11 = vld [vmem:[#allocation7 + $0x7c0] ss:$8 sps:$4 sm:$0xff]  }
 0x13f   :  { %2208 = vmatprep.mubr.bf16.mxu0 %v186_v56  ;;  %2178 = vmatprep.subr.bf16.mxu0 %v2916_v15  ;;  %v2997_v15 = vld [vmem:[#allocation7 + $0x7d4] ss:$8 sps:$4 sm:$0xff]  }
 0x140   :  { %2217 = vmatprep.subr.bf16.mxu1 %v2919_v16  ;;  %v2992_v16 = vld [vmem:[#allocation7 + $0x6e0] ss:$8 sps:$4 sm:$0xff]   ;;  %v3000_v56 = vld [vmem:[#allocation7 + $0x6f4] ss:$8 sps:$4 sm:$0xff]  }
 0x141   :  { %2168 = vmatmul.mubr.bf16.vlgmr.msra.gmra.mrb[8].mxu1 %v183_v20  ;;  %v3293_v20 = vpop.permute.xlu1 %168 }
 0x142   :  { %2179 = vmatpush1.bf16.msra.mxu0 %v2914_v18  ;;  %2218 = vmatpush1.bf16.msra.mxu1 %v2917_v19  ;;  %v3003_v18 = vld [vmem:[#allocation7 + $0x7e4] ss:$8 sps:$4 sm:$0xff]   ;;  %v163_v19 = vrot.slane %v3253_v28, 3  ;;  %v3004_v28 = vld [vmem:[#allocation7 + $0x7f0] ss:$8 sps:$4 sm:$0xff]  }
 0x143   :  { %2249 = vmatprep.mubr.bf16.mxu1 %v188_v23  ;;  %2180 = vmatprep.subr.bf16.mxu0 %v2922_v21  ;;  %v2998_v21 = vld [vmem:[#allocation7 + $0x6f0] ss:$8 sps:$4 sm:$0xff]   ;;  %v151_v23 = vrot.slane %v3251_v27, 2 }
 0x144   :  { %2219 = vmatprep.subr.bf16.mxu1 %v2925_v22  ;;  %v3001_v22 = vld [vmem:[#allocation7 + $0x7e0] ss:$8 sps:$4 sm:$0xff]  }
 0x146   :  { %2181 = vmatpush1.bf16.msra.mxu0 %v2920_v58  ;;  %2220 = vmatpush1.bf16.msra.mxu1 %v2923_v24  ;;  %v149_v58 = vmul.f32 %v3278_v5, %v131_v3  ;;  %v3006_v24 = vld [vmem:[#allocation7 + $0x7f4] ss:$8 sps:$4 sm:$0xff]   ;;  %v3010_v3 = vld [vmem:[#allocation7 + $0x810] ss:$8 sps:$4 sm:$0xff]  }
 0x147   :  { %2182 = vmatprep.subr.bf16.mxu0 %v2928_v25  ;;  %2221 = vmatprep.subr.bf16.mxu1 %v2931_v26  ;;  %v3009_v25 = vld [vmem:[#allocation7 + $0x804] ss:$8 sps:$4 sm:$0xff]   ;;  %v172_v26 = vmul.f32 %v3293_v20, %v163_v19 }
 0x14a   :  { %2183 = vmatpush1.bf16.msra.mxu0 %v2926_v29  ;;  %2222 = vmatpush1.bf16.msra.mxu1 %v2929_v30  ;;  %v3007_v29 = vld [vmem:[#allocation7 + $0x800] ss:$8 sps:$4 sm:$0xff]   ;;  %v160_v30 = vmul.f32 %v3286_v9, %v151_v23  ;;  %v3016_v9 = vld [vmem:[#allocation7 + $0x830] ss:$8 sps:$4 sm:$0xff]  }
 0x14b   :  { %2184 = vmatprep.subr.bf16.mxu0 %v2934_v31  ;;  %2223 = vmatprep.subr.bf16.mxu1 %v2937_v32  ;;  %v185_v31 = vpack.c.bf16 %v149_v58, %v149_v58  ;;  %v3012_v32 = vld [vmem:[#allocation7 + $0x814] ss:$8 sps:$4 sm:$0xff]  }
 0x14c   :  { %v187_v5 = vpack.c.bf16 %v160_v30, %v160_v30 }
 0x14e   :  { %2185 = vmatpush1.bf16.msra.mxu0 %v2932_v33  ;;  %2224 = vmatpush1.bf16.msra.mxu1 %v2935_v34  ;;  %v190_v33 = vpack.c.bf16 %v172_v26, %v172_v26  ;;  %v3015_v34 = vld [vmem:[#allocation7 + $0x824] ss:$8 sps:$4 sm:$0xff]  }
 0x14f   :  { %2186 = vmatprep.subr.bf16.mxu0 %v2940_v35  ;;  %2225 = vmatprep.subr.bf16.mxu1 %v2943_v36  ;;  %v3013_v35 = vld [vmem:[#allocation7 + $0x820] ss:$8 sps:$4 sm:$0xff]   ;;  %v3018_v36 = vld [vmem:[#allocation7 + $0x834] ss:$8 sps:$4 sm:$0xff]  }
 0x152   :  { %2187 = vmatpush1.bf16.msra.mxu0 %v2938_v38  ;;  %2226 = vmatpush1.bf16.msra.mxu1 %v2941_v39  ;;  %v3021_v38 = vld [vmem:[#allocation7 + $0x844] ss:$8 sps:$4 sm:$0xff]   ;;  %v3019_v39 = vld [vmem:[#allocation7 + $0x840] ss:$8 sps:$4 sm:$0xff]  }
 0x153   :  { %2188 = vmatprep.subr.bf16.mxu0 %v2946_v40  ;;  %2227 = vmatprep.subr.bf16.mxu1 %v2949_v41  ;;  %v3024_v40 = vld [vmem:[#allocation7 + $0x854] ss:$8 sps:$4 sm:$0xff]   ;;  %v61_v41 = vld [vmem:[#allocation5 + $0x2] ss:$8 sm:$0x3] }
 0x156   :  { %2189 = vmatpush1.bf16.msra.mxu0 %v2944_v42  ;;  %2228 = vmatpush1.bf16.msra.mxu1 %v2947_v43  ;;  %v3022_v42 = vld [vmem:[#allocation7 + $0x850] ss:$8 sps:$4 sm:$0xff]   ;;  %v483_v43 = vrot.slane %v61_v41, %v3243_v13 }
 0x157   :  { %2190 = vmatprep.subr.bf16.mxu0 %v2952_v44  ;;  %2229 = vmatprep.subr.bf16.mxu1 %v2955_v45  ;;  %v3027_v44 = vld [vmem:[#allocation7 + $0x864] ss:$8 sps:$4 sm:$0xff]  }
 0x15a   :  { %2191 = vmatpush1.bf16.msra.mxu0 %v2950_v46  ;;  %2230 = vmatpush1.bf16.msra.mxu1 %v2953_v47  ;;  %v487_v46 = vrot.slane %v61_v41, %v3245_v14  ;;  %v3031_v14 = vld [vmem:[#allocation7 + $0x880] ss:$8 sps:$4 sm:$0xff]  }
 0x15b   :  { %2192 = vmatprep.subr.bf16.mxu0 %v2958_v48  ;;  %2231 = vmatprep.subr.bf16.mxu1 %v2961_v50  ;;  %v3025_v50 = vld [vmem:[#allocation7 + $0x860] ss:$8 sps:$4 sm:$0xff]  }
 0x15e   :  { %2193 = vmatpush1.bf16.msra.mxu0 %v2956_v51  ;;  %2232 = vmatpush1.bf16.msra.mxu1 %v2959_v52 }
 0x15f   :  { %2194 = vmatprep.subr.bf16.mxu0 %v2964_v53  ;;  %2233 = vmatprep.subr.bf16.mxu1 %v2967_v54  ;;  %v3030_v53 = vld [vmem:[#allocation7 + $0x874] ss:$8 sps:$4 sm:$0xff]  }
 0x162   :  { %2195 = vmatpush1.bf16.msra.mxu0 %v2962_v55  ;;  %2234 = vmatpush1.bf16.msra.mxu1 %v2965_v57 }
 0x163   :  { %2196 = vmatprep.subr.bf16.mxu0 %v2970_v59  ;;  %2235 = vmatprep.subr.bf16.mxu1 %v2973_v60 }
 0x166   :  { %2197 = vmatpush1.bf16.msra.mxu0 %v2968_v61  ;;  %2236 = vmatpush1.bf16.msra.mxu1 %v2971_v37  ;;  %v3028_v61 = vld [vmem:[#allocation7 + $0x870] ss:$8 sps:$4 sm:$0xff]  }
 0x167   :  { %2198 = vmatprep.subr.bf16.mxu0 %v2976_v62  ;;  %2237 = vmatprep.subr.bf16.mxu1 %v2979_v63  ;;  %v3033_v62 = vld [vmem:[#allocation7 + $0x884] ss:$8 sps:$4 sm:$0xff]   ;;  %v3036_v63 = vld [vmem:[#allocation7 + $0x894] ss:$8 sps:$4 sm:$0xff]  }
 0x16a   :  { %2199 = vmatpush1.bf16.msra.mxu0 %v2974_v0  ;;  %2238 = vmatpush1.bf16.msra.mxu1 %v2977_v1  ;;  %v3034_v0 = vld [vmem:[#allocation7 + $0x890] ss:$8 sps:$4 sm:$0xff]   ;;  %v3039_v1 = vld [vmem:[#allocation7 + $0x8a4] ss:$8 sps:$4 sm:$0xff]  }
 0x16b   :  { %2200 = vmatprep.subr.bf16.mxu0 %v2982_v2  ;;  %2239 = vmatprep.subr.bf16.mxu1 %v2985_v49  ;;  %v3037_v2 = vld [vmem:[#allocation7 + $0x8a0] ss:$8 sps:$4 sm:$0xff]   ;;  %v3042_v49 = vld [vmem:[#allocation7 + $0x8b4] ss:$8 sps:$4 sm:$0xff]  }
 0x16e   :  { %2201 = vmatpush1.bf16.msra.mxu0 %v2980_v4  ;;  %2240 = vmatpush1.bf16.msra.mxu1 %v2983_v6  ;;  %v3040_v4 = vld [vmem:[#allocation7 + $0x8b0] ss:$8 sps:$4 sm:$0xff]   ;;  %v3045_v6 = vld [vmem:[#allocation7 + $0x8c4] ss:$8 sps:$4 sm:$0xff]  }
 0x16f   :  { %2202 = vmatprep.subr.bf16.mxu0 %v2988_v7  ;;  %2241 = vmatprep.subr.bf16.mxu1 %v2991_v8  ;;  %v3043_v7 = vld [vmem:[#allocation7 + $0x8c0] ss:$8 sps:$4 sm:$0xff]   ;;  %v3048_v8 = vld [vmem:[#allocation7 + $0x8d4] ss:$8 sps:$4 sm:$0xff]  }
 0x172   :  { %2203 = vmatpush1.bf16.msra.mxu0 %v2986_v10  ;;  %2242 = vmatpush1.bf16.msra.mxu1 %v2989_v11  ;;  %v3046_v10 = vld [vmem:[#allocation7 + $0x8d0] ss:$8 sps:$4 sm:$0xff]   ;;  %v3051_v11 = vld [vmem:[#allocation7 + $0x8e4] ss:$8 sps:$4 sm:$0xff]  }
 0x173   :  { %2204 = vmatprep.subr.bf16.mxu0 %v2994_v12  ;;  %2243 = vmatprep.subr.bf16.mxu1 %v2997_v15  ;;  %v3049_v12 = vld [vmem:[#allocation7 + $0x8e0] ss:$8 sps:$4 sm:$0xff]   ;;  %v162_v15 = vrot.slane %v3251_v27, 3 }
 0x176   :  { %2205 = vmatpush1.bf16.msra.mxu0 %v2992_v16  ;;  %2244 = vmatpush1.bf16.msra.mxu1 %v2995_v17  ;;  %v3054_v16 = vld [vmem:[#allocation7 + $0x8f4] ss:$8 sps:$4 sm:$0xff]   ;;  %v3052_v17 = vld [vmem:[#allocation7 + $0x8f0] ss:$8 sps:$4 sm:$0xff]  }
 0x177   :  { %2206 = vmatprep.subr.bf16.mxu0 %v3000_v56  ;;  %2245 = vmatprep.subr.bf16.mxu1 %v3003_v18  ;;  %v171_v56 = vmul.f32 %v3293_v20, %v162_v15 }
 0x179   :  { %v189_v18 = vpack.c.bf16 %v171_v56, %v171_v56 }
 0x17a   :  { %2207 = vmatpush1.bf16.msra.mxu0 %v2998_v21  ;;  %2246 = vmatpush1.bf16.msra.mxu1 %v3001_v22 }
 0x17b   :  { %2247 = vmatprep.subr.bf16.mxu1 %v3006_v24  ;;  %2258 = vmatprep.subr.bf16.mxu0 %v3009_v25 }
 0x17d   :  { %2209 = vmatmul.mubr.bf16.vlgmr.msra.gmra.mrb[12].mxu0 %v185_v31 }
 0x17e   :  { %2248 = vmatpush1.bf16.msra.mxu1 %v3004_v28  ;;  %2259 = vmatpush1.bf16.msra.mxu0 %v3007_v29 }
 0x17f   :  { %2290 = vmatprep.mubr.bf16.mxu0 %v190_v33  ;;  %2260 = vmatprep.subr.bf16.mxu0 %v3012_v32 }
 0x181   :  { %2250 = vmatmul.mubr.bf16.vlgmr.msra.gmra.mrb[12].mxu1 %v187_v5 }
 0x182   :  { %2261 = vmatpush1.bf16.msra.mxu0 %v3010_v3 }
 0x183   :  { %2262 = vmatprep.subr.bf16.mxu0 %v3015_v34 }
 0x186   :  { %2263 = vmatpush1.bf16.msra.mxu0 %v3013_v35 }
 0x187   :  { %2264 = vmatprep.subr.bf16.mxu0 %v3018_v36 }
 0x18a   :  { %2265 = vmatpush1.bf16.msra.mxu0 %v3016_v9 }
 0x18b   :  { %2266 = vmatprep.subr.bf16.mxu0 %v3021_v38 }
 0x18e   :  { %2267 = vmatpush1.bf16.msra.mxu0 %v3019_v39 }
 0x18f   :  { %2268 = vmatprep.subr.bf16.mxu0 %v3024_v40 }
 0x190   :  { %v1964_v45 = vpop.f32.mrb[0].mxu0 }
 0x191   :  { %v1966_v47 = vpop.f32.mrb[1].mxu0  ;;  %v1965_v51 = vadd.f32 %v1964_v45, %v483_v43 }
 0x192   :  { %2269 = vmatpush1.bf16.msra.mxu0 %v3022_v42  ;;  %v1968_v48 = vpop.f32.mrb[2].mxu0  ;;  %v1967_v54 = vadd.f32 %v1966_v47, %v487_v46 }
 0x193   :  { %v1969_v52 = vpop.f32.mrb[3].mxu0  ;;  %2270 = vmatprep.subr.bf16.mxu0 %v3027_v44 }
 0x194   :  { %v2005_v55 = vpop.f32.mrb[0].mxu1 }
 0x195   :  { %v2006_v57 = vadd.f32 %v2005_v55, %v1965_v51  ;;  %v2007_v59 = vpop.f32.mrb[1].mxu1 }
 0x196   :  { %v2008_v60 = vadd.f32 %v2007_v59, %v1967_v54  ;;  %2271 = vmatpush1.bf16.msra.mxu0 %v3025_v50  ;;  %v2009_v13 = vpop.f32.mrb[2].mxu1 }
 0x197   :  { %v2010_v37 = vpop.f32.mrb[3].mxu1  ;;  %2272 = vmatprep.subr.bf16.mxu0 %v3030_v53 }
 0x198   :  { %v3056_v37 = vld [vmem:[#allocation2 + $0x8] sm:$0xff] }
 0x19a   :  { %2273 = vmatpush1.bf16.msra.mxu0 %v3028_v61 }
 0x19b   :  { %2274 = vmatprep.subr.bf16.mxu0 %v3033_v62 }
 0x19e   :  { %2275 = vmatpush1.bf16.msra.mxu0 %v3031_v14 }
 0x19f   :  { %2276 = vmatprep.subr.bf16.mxu0 %v3036_v63 }
 0x1a2   :  { %2277 = vmatpush1.bf16.msra.mxu0 %v3034_v0 }
 0x1a3   :  { %2278 = vmatprep.subr.bf16.mxu0 %v3039_v1 }
 0x1a6   :  { %2279 = vmatpush1.bf16.msra.mxu0 %v3037_v2 }
 0x1a7   :  { %2280 = vmatprep.subr.bf16.mxu0 %v3042_v49 }
 0x1aa   :  { %2281 = vmatpush1.bf16.msra.mxu0 %v3040_v4 }
 0x1ab   :  { %2282 = vmatprep.subr.bf16.mxu0 %v3045_v6 }
 0x1ae   :  { %2283 = vmatpush1.bf16.msra.mxu0 %v3043_v7 }
 0x1af   :  { %2284 = vmatprep.subr.bf16.mxu0 %v3048_v8 }
 0x1b2   :  { %2285 = vmatpush1.bf16.msra.mxu0 %v3046_v10 }
 0x1b3   :  { %2286 = vmatprep.subr.bf16.mxu0 %v3051_v11 }
 0x1b6   :  { %2287 = vmatpush1.bf16.msra.mxu0 %v3049_v12 }
 0x1b7   :  { %2288 = vmatprep.subr.bf16.mxu0 %v3054_v16 }
 0x1ba   :  { %2289 = vmatpush1.bf16.msra.mxu0 %v3052_v17 }
 0x1bd   :  { %2291 = vmatmul.mubr.bf16.vlgmr.msra.gmra.mrb[16].mxu0 %v189_v18 }
 0x1d0   :  { %v2046_v19 = vpop.f32.mrb[4].mxu0 }
 0x1d1   :  { %v2047_v21 = vadd.f32 %v2046_v19, %v2006_v57  ;;  %v2048_v22 = vpop.f32.mrb[5].mxu0 }
 0x1d2   :  { %v2049_v23 = vadd.f32 %v2048_v22, %v2008_v60  ;;  %v2050_v58 = vpop.f32.mrb[6].mxu0  ;;  %v3055_v60 = vld [vmem:[#allocation2] sm:$0xff] }
 0x1d3   :  { %v2051_v24 = vpop.f32.mrb[7].mxu0 }
 0x1d4   :  { %v2087_v25 = vpop.f32.mrb[4].mxu1 }
 0x1d5   :  { %v2088_v26 = vadd.f32 %v2087_v25, %v2047_v21  ;;  %v2089_v28 = vpop.f32.mrb[5].mxu1 }
 0x1d6   :  { %v2090_v27 = vadd.f32 %v2089_v28, %v2049_v23  ;;  %v2091_v29 = vpop.f32.mrb[6].mxu1 }
 0x1d7   :  { %v2092_v30 = vpop.f32.mrb[7].mxu1 }
 0x210   :  { %v2128_v31 = vpop.f32.mrb[8].mxu0 }
 0x211   :  { %v2129_v32 = vadd.f32 %v2128_v31, %v2088_v26  ;;  %v2130_v33 = vpop.f32.mrb[9].mxu0 }
 0x212   :  { %v2131_v20 = vadd.f32 %v2130_v33, %v2090_v27  ;;  %v2132_v3 = vpop.f32.mrb[10].mxu0 }
 0x213   :  { %v2133_v5 = vpop.f32.mrb[11].mxu0 }
 0x214   :  { %v2169_v34 = vpop.f32.mrb[8].mxu1 }
 0x215   :  { %v2170_v35 = vadd.f32 %v2169_v34, %v2129_v32  ;;  %v2171_v36 = vpop.f32.mrb[9].mxu1 }
 0x216   :  { %v2172_v9 = vadd.f32 %v2171_v36, %v2131_v20  ;;  %v2173_v38 = vpop.f32.mrb[10].mxu1 }
 0x217   :  { %v2174_v39 = vpop.f32.mrb[11].mxu1 }
 0x250   :  { %v2210_v40 = vpop.f32.mrb[12].mxu0 }
 0x251   :  { %v2211_v41 = vadd.f32 %v2210_v40, %v2170_v35  ;;  %v2212_v42 = vpop.f32.mrb[13].mxu0 }
 0x252   :  { %v2213_v43 = vadd.f32 %v2212_v42, %v2172_v9  ;;  %v2214_v44 = vpop.f32.mrb[14].mxu0 }
 0x253   :  { %v2215_v45 = vpop.f32.mrb[15].mxu0 }
 0x254   :  { %v2251_v46 = vpop.f32.mrb[12].mxu1 }
 0x255   :  { %v2252_v47 = vadd.f32 %v2251_v46, %v2211_v41  ;;  %v2253_v48 = vpop.f32.mrb[13].mxu1 }
 0x256   :  { %v2254_v50 = vadd.f32 %v2253_v48, %v2213_v43  ;;  %v2255_v51 = vpop.f32.mrb[14].mxu1 }
 0x257   :  { %v2256_v52 = vpop.f32.mrb[15].mxu1 }
 0x290   :  { %v2292_v53 = vpop.f32.mrb[16].mxu0 }
 0x291   :  { %v2293_v54 = vadd.f32 %v2292_v53, %v2252_v47  ;;  %v2294_v55 = vpop.f32.mrb[17].mxu0 }
 0x292   :  { %v2295_v57 = vadd.f32 %v2294_v55, %v2254_v50  ;;  %v2296_v59 = vpop.f32.mrb[18].mxu0 }
 0x293   :  { %v2299_v13 = vadd.f32 %v3055_v60, %v2293_v54  ;;  %v2297_v61 = vpop.f32.mrb[19].mxu0 }
 0x294   :  { %v2300_v62 = vadd.f32 %v3056_v37, %v2295_v57 }
 0x295   :  { %2301 = vst [vmem:[#allocation8] sm:$0xff] %v2299_v13 }
 0x296   :  { %2302 = vst [vmem:[#allocation8 + $0x8] sm:$0xff] %v2300_v62 }
 0x297   :  { %3134 = shalt.err (!%p3131_p0)
}
 0x298   :  { %s3135_s17 = scalar_lea.hbm %s3321_s4, 256 }
 0x299   :  { %p3136_p1 = scmp.ne.s32.totalorder %s3321_s4, %s3135_s17  ;;  %p3139_p2 = scmp.lt.u32.totalorder %s3135_s17, %s3321_s4 }
 0x29b   :  { %p3141_p3 = pnand %p3139_p2, %p3136_p1 }
 0x29d   :  { %3144 = shalt.err (!%p3141_p3)
}
 0x29e   :  { %2312 = dma.vmem_to_hbm [thread:$0]  %s2310_s13, 256, %s3321_s4, [#allocation4]  }
 0x29f   :  { %3149 = dma.done.wait [#allocation4], 256  }
 0x2a0   :  { %3150 = vsyncadd [#allocation4], 4294967040 }
 0x2a1   :  { %2316 = vsyncpa [#allocation3], 1 }
 0x2a2   :  { %2317 = vsyncpa [#allocation6], 1 }
 0x2a3   :  { %2318 = vsyncpa [#allocation4], 1 }

</bundles_post_ra>
